<compile_context>
chip_gen: v7x
topology: tpu7x:2x2x1
jax: 0.10.0
libtpu: 0.0.40
codegen_flags: <defaults>
</compile_context>

<pallas_src>
import jax
import jax.numpy as jnp
import numpy as np
from jax.experimental import pallas as pl
from jax.experimental.pallas import tpu as pltpu


def _round_up(x, m):
    return ((x + m - 1) // m) * m


def _make_rope_kernel(half):
    def _rope_kernel(pos_ref, inv_ref, cos_ref, sin_ref):
        # pos_ref: (R, 1) int32 | inv_ref: (1, half) f32
        # cos_ref / sin_ref: (R, dim) in output dtype
        pos = pos_ref[...].astype(jnp.float32)        # (R, 1)
        inv = inv_ref[...]                            # (1, half) f32
        freqs = pos * inv                             # (R, half) rank-1 broadcast (VPU)
        cb = jnp.cos(freqs).astype(cos_ref.dtype)     # half-width transcendentals (EUP)
        sb = jnp.sin(freqs).astype(sin_ref.dtype)
        # Gemma layout: emb = cat([freqs, freqs], -1) -> store the same half
        # twice; no (R, dim) concat temp, cast done once.
        cos_ref[:, :half] = cb
        cos_ref[:, half:] = cb
        sin_ref[:, :half] = sb
        sin_ref[:, half:] = sb

    return _rope_kernel


def gemma_rotary_embedding(x, position_ids, dim, base=10000.0, row_tile=None):
    """Returns (cos, sin), each of shape (B, S, dim), dtype = x.dtype."""
    B, S = position_ids.shape
    half = dim // 2
    out_dtype = x.dtype

    # inv_freq exactly as the torch module (float32 exponent / dim, then pow).
    inv_freq = (
        1.0 / (base ** (np.arange(0, dim, 2, dtype=np.float32) / np.float32(dim)))
    ).astype(np.float32)
    inv_freq = jnp.asarray(inv_freq).reshape(1, half)

    # Flatten (B, S) -> N rows.  No padding: the grid uses cdiv and the ragged
    # final block is masked by Pallas on writeback.
    N = B * S
    if row_tile is None:
        R = min(4096, _round_up(N, 8))   # big tile to amortize per-step overhead
    else:
        R = _round_up(int(row_tile), 8)

    pos_rows = position_ids.reshape(N, 1).astype(jnp.int32)

    grid = (pl.cdiv(N, R),)
    out_shape = (
        jax.ShapeDtypeStruct((N, dim), out_dtype),
        jax.ShapeDtypeStruct((N, dim), out_dtype),
    )

    # Scoped-VMEM budget: double-buffered cos/sin blocks + the (R,1) int32
    # position block (lane-padded to 128 lanes in VMEM) + inv_freq block.
    out_bytes = jnp.dtype(out_dtype).itemsize
    blk_bytes = 2 * (2 * R * dim * out_bytes)          # cos + sin, double-buffered
    blk_bytes += 2 * (R * 128 * 4)                     # (R, 1) i32 pads to 128 lanes
    blk_bytes += 2 * (8 * max(half, 128) * 4)          # inv_freq block
    vmem_limit = int(min(max(blk_bytes + (4 << 20), 16 << 20), 40 << 20))

    # TODO(synk): if dim < 128 (small rotary heads) this output is lane-sparse;
    # pack k = 128//dim logical rows per stored row for lane-dense stores.
    grid_spec = pltpu.PrefetchScalarGridSpec(
        num_scalar_prefetch=0,
        grid=grid,
        in_specs=[
            pl.BlockSpec((R, 1), lambda r: (r, 0)),       # position rows
            pl.BlockSpec((1, half), lambda r: (0, 0)),    # inv_freq (constant block)
        ],
        out_specs=[
            pl.BlockSpec((R, dim), lambda r: (r, 0)),
            pl.BlockSpec((R, dim), lambda r: (r, 0)),
        ],
    )

    cos_flat, sin_flat = pl.pallas_call(
        _make_rope_kernel(half),
        out_shape=out_shape,
        grid_spec=grid_spec,
        compiler_params=pltpu.CompilerParams(
            dimension_semantics=("parallel",),
            vmem_limit_bytes=vmem_limit,
        ),
    )(pos_rows, inv_freq)

    cos = cos_flat.reshape(B, S, dim)
    sin = sin_flat.reshape(B, S, dim)
    return cos, sin


def _reference(x, position_ids, dim, base=10000.0):
    inv_freq = 1.0 / (base ** (np.arange(0, dim, 2, dtype=np.float32) / np.float32(dim)))
    inv_freq = jnp.asarray(inv_freq.astype(np.float32))                 # (half,)
    pos = position_ids.astype(jnp.float32)                              # (B, S)
    freqs = pos[:, :, None] * inv_freq[None, None, :]                   # (B, S, half)
    emb = jnp.concatenate([freqs, freqs], axis=-1)                      # (B, S, dim)
    return jnp.cos(emb).astype(x.dtype), jnp.sin(emb).astype(x.dtype)


if __name__ == "__main__":
    key = jax.random.PRNGKey(0)
    B, S, dim = 2, 40, 128
    # x is only used for its dtype (and device) in the torch module.
    x = jax.random.normal(key, (B, S, dim), dtype=jnp.float32)
    position_ids = (
        jnp.arange(S, dtype=jnp.int32)[None, :] + jnp.array([[0], [3]], dtype=jnp.int32)
    )

    cos_ref, sin_ref = _reference(x, position_ids, dim)

    # 1) Default (auto) row tile: single dense block.
    cos, sin = gemma_rotary_embedding(x, position_ids, dim)
    cos, sin = jax.block_until_ready((cos, sin))
    assert cos.shape == (B, S, dim) and sin.shape == (B, S, dim)
    assert cos.dtype == x.dtype and sin.dtype == x.dtype
    np.testing.assert_allclose(np.asarray(cos), np.asarray(cos_ref), atol=1e-5, rtol=1e-5)
    np.testing.assert_allclose(np.asarray(sin), np.asarray(sin_ref), atol=1e-5, rtol=1e-5)

    # 2) Forced small tile (N=80, R=32 -> 3 grid steps, ragged final block):
    #    exercises the no-pad / masked-boundary path.
    cos2, sin2 = gemma_rotary_embedding(x, position_ids, dim, row_tile=32)
    cos2, sin2 = jax.block_until_ready((cos2, sin2))
    np.testing.assert_allclose(np.asarray(cos2), np.asarray(cos_ref), atol=1e-5, rtol=1e-5)
    np.testing.assert_allclose(np.asarray(sin2), np.asarray(sin_ref), atol=1e-5, rtol=1e-5)

    print("KERNEL_OK")
</pallas_src>

<mosaic_0001>
module attributes {stable_mosaic.version = 11 : i64} {
  func.func @_rope_kernel(%arg0: i32, %arg1: memref<80x1xi32, #tpu.memory_space<vmem>>, %arg2: memref<1x64xf32, #tpu.memory_space<vmem>>, %arg3: memref<80x128xf32, #tpu.memory_space<vmem>>, %arg4: memref<80x128xf32, #tpu.memory_space<vmem>>) attributes {dimension_semantics = [#tpu.dimension_semantics<parallel>], iteration_bounds = array<i64: 1>, scalar_prefetch = 0 : i64, scratch_operands = 0 : i64, tpu.core_type = #tpu.core_type<tc>, window_params = [{transform_indices = @transform_0, window_bounds = array<i64: 80, 1>}, {pipeline_mode = #tpu.pipeline_mode<synchronous>, transform_indices = @transform_1, window_bounds = array<i64: 1, 64>}, {transform_indices = @transform_2, window_bounds = array<i64: 80, 128>}, {transform_indices = @transform_3, window_bounds = array<i64: 80, 128>}]} {
    %c0 = arith.constant 0 : index
    %c0_0 = arith.constant 0 : index
    %0 = vector.load %arg1[%c0, %c0_0] : memref<80x1xi32, #tpu.memory_space<vmem>>, vector<80x1xi32>
    %1 = arith.sitofp %0 : vector<80x1xi32> to vector<80x1xf32>
    %c0_1 = arith.constant 0 : index
    %c0_2 = arith.constant 0 : index
    %2 = vector.load %arg2[%c0_1, %c0_2] : memref<1x64xf32, #tpu.memory_space<vmem>>, vector<1x64xf32>
    %3 = vector.broadcast %1 : vector<80x1xf32> to vector<80x64xf32>
    %4 = vector.broadcast %2 : vector<1x64xf32> to vector<80x64xf32>
    %5 = arith.mulf %3, %4 : vector<80x64xf32>
    %6 = math.cos %5 : vector<80x64xf32>
    %7 = math.sin %5 : vector<80x64xf32>
    %c0_3 = arith.constant 0 : index
    %c0_4 = arith.constant 0 : index
    %8 = vector.load %arg3[%c0_3, %c0_4] : memref<80x128xf32, #tpu.memory_space<vmem>>, vector<80x64xf32>
    tpu.vector_store %arg3[%c0_3, %c0_4], %6 {strides = array<i32>} : memref<80x128xf32, #tpu.memory_space<vmem>>, vector<80x64xf32>,
    %c0_5 = arith.constant 0 : index
    %c64 = arith.constant 64 : index
    %9 = vector.load %arg3[%c0_5, %c64] : memref<80x128xf32, #tpu.memory_space<vmem>>, vector<80x64xf32>
    tpu.vector_store %arg3[%c0_5, %c64], %6 {strides = array<i32>} : memref<80x128xf32, #tpu.memory_space<vmem>>, vector<80x64xf32>,
    %c0_6 = arith.constant 0 : index
    %c0_7 = arith.constant 0 : index
    %10 = vector.load %arg4[%c0_6, %c0_7] : memref<80x128xf32, #tpu.memory_space<vmem>>, vector<80x64xf32>
    tpu.vector_store %arg4[%c0_6, %c0_7], %7 {strides = array<i32>} : memref<80x128xf32, #tpu.memory_space<vmem>>, vector<80x64xf32>,
    %c0_8 = arith.constant 0 : index
    %c64_9 = arith.constant 64 : index
    %11 = vector.load %arg4[%c0_8, %c64_9] : memref<80x128xf32, #tpu.memory_space<vmem>>, vector<80x64xf32>
    tpu.vector_store %arg4[%c0_8, %c64_9], %7 {strides = array<i32>} : memref<80x128xf32, #tpu.memory_space<vmem>>, vector<80x64xf32>,
    return
  }
  func.func @transform_0(%arg0: i32) -> (i32, i32) {
    %c0_i32 = arith.constant 0 : i32
    %c0_i32_0 = arith.constant 0 : i32
    return %arg0, %c0_i32 : i32, i32
  }
  func.func @transform_1(%arg0: i32) -> (i32, i32) {
    %c0_i32 = arith.constant 0 : i32
    %c0_i32_0 = arith.constant 0 : i32
    %c0_i32_1 = arith.constant 0 : i32
    return %c0_i32, %c0_i32_0 : i32, i32
  }
  func.func @transform_2(%arg0: i32) -> (i32, i32) {
    %c0_i32 = arith.constant 0 : i32
    %c0_i32_0 = arith.constant 0 : i32
    return %arg0, %c0_i32 : i32, i32
  }
  func.func @transform_3(%arg0: i32) -> (i32, i32) {
    %c0_i32 = arith.constant 0 : i32
    %c0_i32_0 = arith.constant 0 : i32
    return %arg0, %c0_i32 : i32, i32
  }
}

</mosaic_0001>

<bundles_post_ra>
// kernel: tpu_custom_call.1
= control target key start
LH: loop header
LB: loop body
LE: loop exit
PB: predicated region body
PF: predicated region fallthrough
CT: control target
= control target key end

     0   :  { %9 = vsyncpa [#allocation3], 0  ;;  %v2550_v3 = vmov 0   ;;  %s3784_s0 = inlined_call_operand.vmem [shape: s32[80,1], index: 0, kind: input, shape index: {}]   ;;  %s3785_s1 = inlined_call_operand.vmem [shape: f32[1,64], index: 1, kind: input, shape index: {}]   ;;  %s3786_s2 = inlined_call_operand.hbm [shape: f32[80,128], index: 2, kind: output, shape index: {0}]   ;;  %s3787_s3 = inlined_call_operand.hbm [shape: f32[80,128], index: 3, kind: output, shape index: {1}]  }
   0x1   :  { %v17_v0 = vld [vmem:[%s3784_s0 + $0x10] sm:$0xff]  ;;  %v15_v1 = vld [vmem:[%s3784_s0] sm:$0xff]  ;;  %v18_v2 = vld [vmem:[%s3784_s0 + $0x18] sm:$0xff]  ;;  %2460 = vset.pattern.permute.xlu1 %v2550_v3  ;;  %2459 = vset.pattern.permute.xlu0 %v2550_v3 }
   0x2   :  { %v27_v4 = vcvt.s32.f32 %v17_v0  ;;  %v25_v5 = vcvt.s32.f32 %v15_v1  ;;  %v16_v6 = vld [vmem:[%s3784_s0 + $0x8] sm:$0xff]  ;;  %v28_v7 = vcvt.s32.f32 %v18_v2  ;;  %v19_v10 = vld [vmem:[%s3784_s0 + $0x20] sm:$0xff] }
   0x3   :  { %v26_v8 = vcvt.s32.f32 %v16_v6  ;;  %v20_v9 = vld [vmem:[%s3784_s0 + $0x28] sm:$0xff] }
   0x4   :  { %48 = vperm.xlu1 %2460, %v27_v4   ;;  %38 = vperm.xlu0 %2459, %v25_v5  }
   0x5   :  { %10 = vsyncpa [#allocation5], 0  ;;  %v30_v11 = vcvt.s32.f32 %v20_v9  ;;  %v29_v12 = vcvt.s32.f32 %v19_v10  ;;  %v22_v13 = vld [vmem:[%s3784_s0 + $0x38] sm:$0xff]  ;;  %v21_v14 = vld [vmem:[%s3784_s0 + $0x30] sm:$0xff]  ;;  %v2551_v60 = vmov 683565275  }
   0x6   :  { %v32_v15 = vcvt.s32.f32 %v22_v13  ;;  %v31_v16 = vcvt.s32.f32 %v21_v14  ;;  %v24_v17 = vld [vmem:[%s3784_s0 + $0x48] sm:$0xff]  ;;  %v23_v18 = vld [vmem:[%s3784_s0 + $0x40] sm:$0xff]  ;;  %v2552_v62 = vmov 2475754826   ;;  %v2553_v0 = vmov 2131351028  }
   0x7   :  { %v34_v19 = vcvt.s32.f32 %v24_v17  ;;  %v33_v20 = vcvt.s32.f32 %v23_v18  ;;  %v2615_v21 = vld [vmem:[%s3785_s1] ss:$0 sm:$0xff]  ;;  %v3798_v2 = vmov 2102212464   ;;  %v2555_v4 = vmov 920167782  }
   0x8   :  { %53 = vperm.xlu1 %2460, %v28_v7   ;;  %43 = vperm.xlu0 %2459, %v26_v8   ;;  %s2558_s8 = smov [#allocation2]  }
   0x9   :  { %s2299_s9 = sshll.u32 %s2558_s8, 4  ;;  %s2300_s9 = int_to_ptr.vmem [resolvable:$true] %s2299_s9 }
   0xa   :  { %s2502_s10 = scalar_lea.vmem %s2300_s9, 1280  ;;  %p2507_p1 = scmp.lt.s32.totalorder %s2300_s9, %s2300_s9 }
   0xb   :  { %p2503_p0 = scmp.ne.s32.totalorder %s2300_s9, %s2502_s10  ;;  %p2508_p2 = scmp.lt.s32.totalorder %s2502_s10, %s2502_s10 }
   0xc   :  { %63 = vperm.xlu1 %2460, %v30_v11   ;;  %58 = vperm.xlu0 %2459, %v29_v12   ;;  %v2556_v12 = vmov 1326507024  }
   0xd   :  { %p2509_p3 = por %p2508_p2, %p2507_p1 }
   0xf   :  { %p2510_p4 = pnand %p2509_p3, %p2503_p0 }
  0x10   :  { %73 = vperm.xlu1 %2460, %v32_v15   ;;  %68 = vperm.xlu0 %2459, %v31_v16  }
  0x14   :  { %83 = vperm.xlu1 %2460, %v34_v19   ;;  %78 = vperm.xlu0 %2459, %v33_v20  }
  0x83   :  { %v49_v22 = vpop.permute.xlu1 %48  ;;  %v39_v23 = vpop.permute.xlu0 %38 }
  0x84   :  { %v2618_v24 = vmul.f32 %v2615_v21, %v49_v22  ;;  %v2621_v25 = vmul.f32 %v2615_v21, %v39_v23 }
  0x86   :  { %v3795_v26 = vand.u32 2147483647, %v2618_v24  ;;  %v311_v27 = vand.u32 2139095040, %v2618_v24  ;;  %v3796_v28 = vand.u32 2147483647, %v2621_v25  ;;  %v105_v29 = vand.u32 2139095040, %v2621_v25 }
  0x87   :  { %v54_v30 = vpop.permute.xlu1 %53  ;;  %v44_v38 = vpop.permute.xlu0 %43 }
  0x88   :  { %v312_v31 = vshrl.u32 %v311_v27, 23  ;;  %v315_v32 = vand.u32 8388607, %v3795_v26  ;;  %v109_v33 = vand.u32 8388607, %v3796_v28  ;;  %v2632_v34 = vmul.f32 %v2615_v21, %v54_v30 }
  0x89   :  { %v106_v35 = vshrl.u32 %v105_v29, 23  ;;  %v2641_v47 = vmul.f32 %v2615_v21, %v44_v38 }
  0x8a   :  { %v2335_v36 = vadd.s32 4294967169, %v312_v31  ;;  %v3793_v37 = vand.u32 2147483647, %v2632_v34  ;;  %v316_v39 = vor.u32 8388608, %v315_v32  ;;  %v414_v41 = vand.u32 2139095040, %v2632_v34 }
  0x8b   :  { %v2327_v40 = vadd.s32 4294967169, %v106_v35  ;;  %v110_v43 = vor.u32 8388608, %v109_v33  ;;  %v208_v58 = vand.u32 2139095040, %v2641_v47 }
  0x8c   :  { %v318_v42 = vadd.s32 1, %v2335_v36  ;;  %v415_v45 = vshrl.u32 %v414_v41, 23  ;;  %v2638_v46 = vand.u32 8388607, %v3793_v37  ;;  %v2643_v49 = vshll.u32 %v316_v39, 8 }
  0x8d   :  { %v112_v44 = vadd.s32 1, %v2327_v40  ;;  %v2645_v54 = vshll.u32 %v110_v43, 8 }
  0x8e   :  { %vm319_vm0 = vcmp.gt.s32.totalorder %v318_v42, 0  ;;  %v2339_v50 = vadd.s32 4294967169, %v415_v45  ;;  %v419_v57 = vor.u32 8388608, %v2638_v46 }
  0x8f   :  { %v320_v48 = vsel %vm319_vm0, %v318_v42, 0  ;;  %vm113_vm1 = vcmp.gt.s32.totalorder %v112_v44, 0 }
  0x90   :  { %v321_v51 = vshrl.u32 %v320_v48, 5  ;;  %v322_v52 = vand.u32 31, %v320_v48  ;;  %v114_v53 = vsel %vm113_vm1, %v112_v44, 0  ;;  %v2656_v6 = vadd.s32 1, %v2339_v50 }
  0x91   :  { %v2647_v55 = vshrl.u32 %v114_v53, 5  ;;  %v116_v56 = vand.u32 31, %v114_v53 }
  0x92   :  { %v323_v59 = vsub.s32 32, %v322_v52  ;;  %v325_v61 = vshll.u32 %v2551_v60, %v322_v52  ;;  %v328_v63 = vshll.u32 %v2552_v62, %v322_v52  ;;  %v331_v1 = vshll.u32 %v2553_v0, %v322_v52 }
  0x93   :  { %v334_v3 = vshll.u32 %v3798_v2, %v322_v52  ;;  %v337_v5 = vshll.u32 %v2555_v4, %v322_v52  ;;  %vm340_vm2 = vcmp.lt.s32.totalorder %v321_v51, 1  ;;  %vm341_vm3 = vcmp.lt.s32.totalorder %v321_v51, 2 }
  0x94   :  { %v324_v7 = vshrl.u32 %v2551_v60, %v323_v59  ;;  %v326_v8 = vshrl.u32 %v2552_v62, %v323_v59  ;;  %v329_v9 = vshrl.u32 %v2553_v0, %v323_v59  ;;  %v332_v10 = vshrl.u32 %v3798_v2, %v323_v59 }
  0x95   :  { %v335_v11 = vshrl.u32 %v2555_v4, %v323_v59  ;;  %v338_v13 = vshrl.u32 %v2556_v12, %v323_v59  ;;  %vm342_vm4 = vcmp.lt.s32.totalorder %v321_v51, 3  ;;  %v117_v17 = vsub.s32 32, %v116_v56 }
  0x96   :  { %v327_v14 = vor.u32 %v326_v8, %v325_v61  ;;  %v330_v15 = vor.u32 %v329_v9, %v328_v63  ;;  %v333_v16 = vor.u32 %v332_v10, %v331_v1  ;;  %vm343_vm5 = vcmp.lt.s32.totalorder %v321_v51, 4 }
  0x97   :  { %v336_v18 = vor.u32 %v335_v11, %v334_v3  ;;  %v339_v19 = vor.u32 %v338_v13, %v337_v5  ;;  %v119_v20 = vshll.u32 %v2551_v60, %v116_v56  ;;  %v122_v33 = vshll.u32 %v2552_v62, %v116_v56 }
  0x98   :  { %v344_v22 = vsel %vm340_vm2, %v324_v7, %v327_v14  ;;  %v345_v23 = vsel %vm343_vm5, %v333_v16, 2102212464  ;;  %v348_v27 = vsel %vm340_vm2, %v327_v14, %v330_v15  ;;  %v352_v29 = vsel %vm340_vm2, %v330_v15, %v333_v16 }
  0x99   :  { %v346_v30 = vsel %vm342_vm4, %v330_v15, %v345_v23  ;;  %v349_v31 = vsel %vm343_vm5, %v336_v18, 920167782  ;;  %v353_v32 = vsel %vm343_vm5, %v339_v19, 1326507024  ;;  %v118_v38 = vshrl.u32 %v2551_v60, %v117_v17 }
  0x9a   :  { %v350_v35 = vsel %vm342_vm4, %v333_v16, %v349_v31  ;;  %v354_v36 = vsel %vm342_vm4, %v336_v18, %v353_v32  ;;  %v120_v39 = vshrl.u32 %v2552_v62, %v117_v17  ;;  %v347_v40 = vsel %vm341_vm3, %v344_v22, %v346_v30 }
  0x9b   :  { %v351_v41 = vsel %vm341_vm3, %v348_v27, %v350_v35  ;;  %v355_v42 = vsel %vm341_vm3, %v352_v29, %v354_v36  ;;  %v123_v43 = vshrl.u32 %v2553_v0, %v117_v17  ;;  %v125_v59 = vshll.u32 %v2553_v0, %v116_v56 }
  0x9c   :  { %v2679_v44 = vmul.u32.u64.low %v2643_v49, %v355_v42  ;;  %v2680_v45 = vmul.u32.u64.high %v2643_v49, %v355_v42, %v2679_v44  ;;  %v2683_v48 = vmul.u32.u64.low %v2643_v49, %v351_v41  ;;  %v2684_v50 = vmul.u32.u64.high %v2643_v49, %v351_v41, %v2683_v48 }
  0x9d   :  { %v121_v52 = vor.u32 %v120_v39, %v119_v20  ;;  %v124_v53 = vor.u32 %v123_v43, %v122_v33  ;;  %v126_v61 = vshrl.u32 %v3798_v2, %v117_v17  ;;  %v363_v51 = vmul.u32 %v2643_v49, %v347_v40 }
  0x9e   :  { %v128_v63 = vshll.u32 %v3798_v2, %v116_v56  ;;  %v129_v1 = vshrl.u32 %v2555_v4, %v117_v17  ;;  %v132_v3 = vshrl.u32 %v2556_v12, %v117_v17  ;;  %v131_v7 = vshll.u32 %v2555_v4, %v116_v56 }
  0x9f   :  { %v127_v5 = vor.u32 %v126_v61, %v125_v59  ;;  %vm134_vm6 = vcmp.lt.s32.totalorder %v2647_v55, 1  ;;  %vm135_vm7 = vcmp.lt.s32.totalorder %v2647_v55, 2  ;;  %vm365_vm8 = vc.u32 %v2680_v45, %v2683_v48 }
  0xa0   :  { %v366_v8 = vadd.s32 1, %v2684_v50  ;;  %v130_v9 = vor.u32 %v129_v1, %v128_v63  ;;  %vm136_vm9 = vcmp.lt.s32.totalorder %v2647_v55, 3  ;;  %v133_v49 = vor.u32 %v132_v3, %v131_v7 }
  0xa1   :  { %vm137_vm10 = vcmp.lt.s32.totalorder %v2647_v55, 4  ;;  %v138_v10 = vsel %vm134_vm6, %v118_v38, %v121_v52  ;;  %v142_v11 = vsel %vm134_vm6, %v121_v52, %v124_v53  ;;  %v146_v15 = vsel %vm134_vm6, %v124_v53, %v127_v5 }
  0xa2   :  { %v367_v13 = vsel %vm365_vm8, %v366_v8, %v2684_v50  ;;  %v139_v56 = vsel %vm137_vm10, %v127_v5, 2102212464  ;;  %v143_v14 = vsel %vm137_vm10, %v130_v9, 920167782  ;;  %v147_v19 = vsel %vm137_vm10, %v133_v49, 1326507024 }
  0xa3   :  { %v368_v16 = vadd.s32 %v367_v13, %v363_v51  ;;  %v140_v17 = vsel %vm136_vm9, %v124_v53, %v139_v56  ;;  %v144_v18 = vsel %vm136_vm9, %v127_v5, %v143_v14  ;;  %v148_v22 = vsel %vm136_vm9, %v130_v9, %v147_v19 }
  0xa4   :  { %v145_v20 = vsel %vm135_vm7, %v142_v11, %v144_v18  ;;  %vm422_vm11 = vcmp.gt.s32.totalorder %v2656_v6, 0  ;;  %v209_v23 = vshrl.u32 %v208_v58, 23  ;;  %v149_v29 = vsel %vm135_vm7, %v146_v15, %v148_v22 }
  0xa5   :  { %v369_v27 = vadd.s32 536870912, %v368_v16  ;;  %v2710_v30 = vmul.u32.u64.low %v2645_v54, %v145_v20  ;;  %v2711_v31 = vmul.u32.u64.high %v2645_v54, %v145_v20, %v2710_v30  ;;  %v141_v32 = vsel %vm135_vm7, %v138_v10, %v140_v17 }
  0xa6   :  { %v2717_v33 = vmul.u32.u64.low %v2645_v54, %v149_v29  ;;  %v2718_v35 = vmul.u32.u64.high %v2645_v54, %v149_v29, %v2717_v33  ;;  %v423_v36 = vsel %vm422_vm11, %v2656_v6, 0  ;;  %v2725_v39 = vshll.u32 %v419_v57, 8 }
  0xa7   :  { %v2721_v38 = vshrl.u32 %v369_v27, 30  ;;  %v425_v58 = vand.u32 31, %v423_v36  ;;  %v3794_v40 = vand.u32 2147483647, %v2641_v47  ;;  %v2331_v41 = vadd.s32 4294967169, %v209_v23 }
  0xa8   :  { %v157_v55 = vmul.u32 %v2645_v54, %v141_v32  ;;  %v160_v43 = vadd.s32 1, %v2711_v31  ;;  %vm159_vm12 = vc.u32 %v2718_v35, %v2710_v30  ;;  %v424_v6 = vshrl.u32 %v423_v36, 5 }
  0xa9   :  { %v371_v42 = vshll.u32 %v2721_v38, 30  ;;  %v426_v44 = vsub.s32 32, %v425_v58  ;;  %v428_v50 = vshll.u32 %v2551_v60, %v425_v58  ;;  %v431_v46 = vshll.u32 %v2552_v62, %v425_v58 }
  0xaa   :  { %v161_v52 = vsel %vm159_vm12, %v160_v43, %v2711_v31  ;;  %v434_v59 = vshll.u32 %v2553_v0, %v425_v58  ;;  %v437_v63 = vshll.u32 %v3798_v2, %v425_v58  ;;  %v440_v7 = vshll.u32 %v2555_v4, %v425_v58 }
  0xab   :  { %v2735_v57 = vsub.s32 %v368_v16, %v371_v42  ;;  %v429_v53 = vshrl.u32 %v2552_v62, %v426_v44  ;;  %v162_v54 = vadd.s32 %v161_v52, %v157_v55  ;;  %v432_v61 = vshrl.u32 %v2553_v0, %v426_v44  ;;  %v64_v42 = vpop.permute.xlu1 %63 }
  0xac   :  { %v435_v51 = vshrl.u32 %v3798_v2, %v426_v44  ;;  %v438_v5 = vshrl.u32 %v2555_v4, %v426_v44  ;;  %v441_v10 = vshrl.u32 %v2556_v12, %v426_v44  ;;  %v427_v13 = vshrl.u32 %v2551_v60, %v426_v44 }
  0xad   :  { %v374_v1 = vsub.s32 0, %v2735_v57  ;;  %v430_v3 = vor.u32 %v429_v53, %v428_v50  ;;  %v163_v8 = vadd.s32 536870912, %v162_v54  ;;  %v433_v9 = vor.u32 %v432_v61, %v431_v46 }
  0xae   :  { %v436_v49 = vor.u32 %v435_v51, %v434_v59  ;;  %v439_v56 = vor.u32 %v438_v5, %v437_v63  ;;  %v215_v14 = vadd.s32 1, %v2331_v41  ;;  %v442_v16 = vor.u32 %v441_v10, %v440_v7 }
  0xaf   :  { %v2336_v11 = vmin.u32 %v374_v1, %v2735_v57  ;;  %v2749_v15 = vshrl.u32 %v163_v8, 30  ;;  %vm443_vm13 = vcmp.lt.s32.totalorder %v424_v6, 1  ;;  %vm446_vm14 = vcmp.lt.s32.totalorder %v424_v6, 4 }
  0xb0   :  { %vm444_vm15 = vcmp.lt.s32.totalorder %v424_v6, 2  ;;  %v448_v18 = vsel %vm446_vm14, %v436_v49, 2102212464  ;;  %v451_v19 = vsel %vm443_vm13, %v430_v3, %v433_v9  ;;  %vm445_vm0 = vcmp.lt.s32.totalorder %v424_v6, 3 }
  0xb1   :  { %v376_v17 = vclz %v2336_v11  ;;  %v165_v20 = vshll.u32 %v2749_v15, 30  ;;  %v452_v22 = vsel %vm446_vm14, %v439_v56, 920167782  ;;  %v455_v23 = vsel %vm443_vm13, %v433_v9, %v436_v49 }
  0xb2   :  { %v447_v29 = vsel %vm443_vm13, %v427_v13, %v430_v3  ;;  %v453_v31 = vsel %vm445_vm0, %v436_v49, %v452_v22  ;;  %v456_v32 = vsel %vm446_vm14, %v442_v16, 1326507024  ;;  %v449_v36 = vsel %vm445_vm0, %v433_v9, %v448_v18 }
  0xb3   :  { %v2337_v27 = vadd.s32 4294967294, %v376_v17  ;;  %v2752_v33 = vsub.s32 %v162_v54, %v165_v20  ;;  %v454_v58 = vsel %vm444_vm15, %v451_v19, %v453_v31  ;;  %v457_v41 = vsel %vm445_vm0, %v439_v56, %v456_v32 }
  0xb4   :  { %v458_v55 = vsel %vm444_vm15, %v455_v23, %v457_v41  ;;  %v2757_v43 = vmul.u32.u64.low %v2725_v39, %v454_v58  ;;  %v2758_v44 = vmul.u32.u64.high %v2725_v39, %v454_v58, %v2757_v43  ;;  %v450_v59 = vsel %vm444_vm15, %v447_v29, %v449_v36 }
  0xb5   :  { %vm2338_vm1 = vcmp.lt.s32.totalorder %v2337_v27, 0  ;;  %v168_v46 = vsub.s32 0, %v2752_v33  ;;  %v2763_v52 = vmul.u32.u64.low %v2725_v39, %v458_v55  ;;  %v2764_v53 = vmul.u32.u64.high %v2725_v39, %v458_v55, %v2763_v52 }
  0xb6   :  { %v379_v50 = vsel %vm2338_vm1, 0, %v2337_v27  ;;  %v212_v54 = vand.u32 8388607, %v3794_v40  ;;  %vm216_vm2 = vcmp.gt.s32.totalorder %v215_v14, 0  ;;  %v2770_v61 = vmul.f32 %v2615_v21, %v64_v42 }
  0xb7   :  { %v2328_v51 = vmin.u32 %v168_v46, %v2752_v33  ;;  %v217_v63 = vsel %vm216_vm2, %v215_v14, 0  ;;  %v380_v1 = vsub.s32 32, %v379_v50  ;;  %v384_v3 = vsub.s32 4294967266, %v379_v50 }
  0xb8   :  { %v469_v5 = vadd.s32 1, %v2758_v44  ;;  %v466_v8 = vmul.u32 %v2725_v39, %v450_v59  ;;  %vm468_vm3 = vc.u32 %v2764_v53, %v2757_v43  ;;  %v219_v6 = vand.u32 31, %v217_v63 }
  0xb9   :  { %v170_v7 = vclz %v2328_v51  ;;  %v364_v9 = vadd.s32 %v2683_v48, %v2680_v45  ;;  %v213_v10 = vor.u32 8388608, %v212_v54  ;;  %v3789_v11 = vand.u32 2147483647, %v2770_v61 }
  0xba   :  { %v470_v49 = vsel %vm468_vm3, %v469_v5, %v2758_v44  ;;  %v220_v14 = vsub.s32 32, %v219_v6  ;;  %v620_v16 = vand.u32 2139095040, %v2770_v61  ;;  %v381_v17 = vshll.u32 %v2735_v57, %v379_v50 }
  0xbb   :  { %v2329_v13 = vadd.s32 4294967294, %v170_v7  ;;  %v471_v56 = vadd.s32 %v470_v49, %v466_v8  ;;  %v382_v39 = vshrl.u32 %v364_v9, %v380_v1  ;;  %v385_v18 = vadd.s32 127, %v384_v3 }
  0xbc   :  { %v158_v19 = vadd.s32 %v2710_v30, %v2718_v35  ;;  %v2785_v45 = vshrl.u32 %v217_v63, 5  ;;  %v223_v48 = vshrl.u32 %v2552_v62, %v220_v14  ;;  %v222_v23 = vshll.u32 %v2551_v60, %v219_v6 }
  0xbd   :  { %vm2330_vm4 = vcmp.lt.s32.totalorder %v2329_v13, 0  ;;  %v472_v20 = vadd.s32 536870912, %v471_v56  ;;  %v226_v27 = vshrl.u32 %v2553_v0, %v220_v14  ;;  %v229_v29 = vshrl.u32 %v3798_v2, %v220_v14 }
  0xbe   :  { %v173_v22 = vsel %vm2330_vm4, 0, %v2329_v13  ;;  %v225_v32 = vshll.u32 %v2552_v62, %v219_v6  ;;  %v228_v30 = vshll.u32 %v2553_v0, %v219_v6  ;;  %v386_v35 = vshll.u32 %v385_v18, 23 }
  0xbf   :  { %v178_v31 = vsub.s32 4294967266, %v173_v22  ;;  %v2791_v57 = vshrl.u32 %v472_v20, 30  ;;  %v224_v36 = vor.u32 %v223_v48, %v222_v23  ;;  %v2795_v58 = vshll.u32 %v213_v10, 8 }
  0xc0   :  { %v621_v41 = vshrl.u32 %v620_v16, 23  ;;  %v227_v44 = vor.u32 %v226_v27, %v225_v32  ;;  %v230_v50 = vor.u32 %v229_v29, %v228_v30  ;;  %v231_v46 = vshll.u32 %v3798_v2, %v219_v6 }
  0xc1   :  { %v179_v42 = vadd.s32 127, %v178_v31  ;;  %v474_v55 = vshll.u32 %v2791_v57, 30  ;;  %v232_v52 = vshrl.u32 %v2555_v4, %v220_v14  ;;  %v234_v59 = vshll.u32 %v2555_v4, %v219_v6 }
  0xc2   :  { %v235_v54 = vshrl.u32 %v2556_v12, %v220_v14  ;;  %v383_v51 = vor.u32 %v382_v39, %v381_v17  ;;  %v174_v63 = vsub.s32 32, %v173_v22  ;;  %vm237_vm5 = vcmp.lt.s32.totalorder %v2785_v45, 1 }
  0xc3   :  { %v2802_v1 = vsub.s32 %v471_v56, %v474_v55  ;;  %v387_v3 = vor.u32 4788187, %v386_v35  ;;  %v180_v5 = vshll.u32 %v179_v42, 23  ;;  %v233_v7 = vor.u32 %v232_v52, %v231_v46  ;;  %v59_v46 = vpop.permute.xlu0 %58 }
  0xc4   :  { %v236_v8 = vor.u32 %v235_v54, %v234_v59  ;;  %v175_v9 = vshll.u32 %v2752_v33, %v173_v22  ;;  %v221_v10 = vshrl.u32 %v2551_v60, %v220_v14  ;;  %vm240_vm6 = vcmp.lt.s32.totalorder %v2785_v45, 4 }
  0xc5   :  { %v477_v49 = vsub.s32 0, %v2802_v1  ;;  %vm239_vm7 = vcmp.lt.s32.totalorder %v2785_v45, 3  ;;  %v242_v6 = vsel %vm240_vm6, %v230_v50, 2102212464  ;;  %v245_v13 = vsel %vm237_vm5, %v224_v36, %v227_v44 }
  0xc6   :  { %v246_v56 = vsel %vm240_vm6, %v233_v7, 920167782  ;;  %v176_v16 = vshrl.u32 %v158_v19, %v174_v63  ;;  %vm238_vm8 = vcmp.lt.s32.totalorder %v2785_v45, 2  ;;  %v181_v33 = vor.u32 4788187, %v180_v5  ;;  %v74_v45 = vpop.permute.xlu1 %73 }
  0xc7   :  { %v2340_v17 = vmin.u32 %v477_v49, %v2802_v1  ;;  %v247_v39 = vsel %vm239_vm7, %v230_v50, %v246_v56  ;;  %v249_v14 = vsel %vm237_vm5, %v227_v44, %v230_v50  ;;  %v250_v20 = vsel %vm240_vm6, %v236_v8, 1326507024 }
  0xc8   :  { %v248_v18 = vsel %vm238_vm8, %v245_v13, %v247_v39  ;;  %v241_v22 = vsel %vm237_vm5, %v221_v10, %v224_v36  ;;  %v243_v23 = vsel %vm239_vm7, %v227_v44, %v242_v6  ;;  %v251_v27 = vsel %vm239_vm7, %v233_v7, %v250_v20 }
  0xc9   :  { %v479_v48 = vclz %v2340_v17  ;;  %v252_v19 = vsel %vm238_vm8, %v249_v14, %v251_v27  ;;  %v2823_v29 = vmul.u32.u64.low %v2795_v58, %v248_v18  ;;  %v2824_v31 = vmul.u32.u64.high %v2795_v58, %v248_v18, %v2823_v29 }
  0xca   :  { %v2347_v32 = vadd.s32 4294967169, %v621_v41  ;;  %v2828_v35 = vmul.u32.u64.low %v2795_v58, %v252_v19  ;;  %v2829_v42 = vmul.u32.u64.high %v2795_v58, %v252_v19, %v2828_v35  ;;  %v177_v55 = vor.u32 %v176_v16, %v175_v9 }
  0xcb   :  { %v2341_v30 = vadd.s32 4294967294, %v479_v48  ;;  %v467_v36 = vadd.s32 %v2757_v43, %v2764_v53  ;;  %v624_v44 = vand.u32 8388607, %v3789_v11  ;;  %v388_v52 = vand.u32 2147483647, %v387_v3 }
  0xcc   :  { %v627_v50 = vadd.s32 1, %v2347_v32  ;;  %v390_v59 = vcvt.s32.f32 %v383_v51  ;;  %v244_v41 = vsel %vm238_vm8, %v241_v22, %v243_v23  ;;  %v182_v54 = vand.u32 2147483647, %v181_v33 }
  0xcd   :  { %vm2342_vm9 = vcmp.lt.s32.totalorder %v2341_v30, 0  ;;  %v263_v5 = vadd.s32 1, %v2824_v31  ;;  %v625_v9 = vor.u32 8388608, %v624_v44  ;;  %v2839_v43 = vmul.f32 %v2615_v21, %v59_v46 }
  0xce   :  { %v482_v63 = vsel %vm2342_vm9, 0, %v2341_v30  ;;  %vm628_vm10 = vcmp.gt.s32.totalorder %v627_v50, 0  ;;  %v184_v53 = vcvt.s32.f32 %v177_v55  ;;  %v260_v49 = vmul.u32 %v2795_v58, %v244_v41 }
  0xcf   :  { %v483_v7 = vsub.s32 32, %v482_v63  ;;  %v487_v8 = vsub.s32 4294967266, %v482_v63  ;;  %vm262_vm11 = vc.u32 %v2829_v42, %v2823_v29  ;;  %v629_v51 = vsel %vm628_vm10, %v627_v50, 0 }
  0xd0   :  { %v264_v6 = vsel %vm262_vm11, %v263_v5, %v2824_v31  ;;  %v2845_v13 = vmul.f32 %v390_v59, %v388_v52  ;;  %v2847_v56 = vmul.f32 %v184_v53, %v182_v54  ;;  %v631_v17 = vand.u32 31, %v629_v51 }
  0xd1   :  { %v485_v3 = vshrl.u32 %v467_v36, %v483_v7  ;;  %v488_v10 = vadd.s32 127, %v487_v8  ;;  %v265_v16 = vadd.s32 %v264_v6, %v260_v49  ;;  %v484_v39 = vshll.u32 %v2802_v1, %v482_v63 }
  0xd2   :  { %v2850_v33 = vshll.u32 %v625_v9, 8  ;;  %v3792_v58 = vand.u32 2147483647, %v2839_v43  ;;  %v2854_v18 = vmul.f32 %v2615_v21, %v74_v45  ;;  %v630_v20 = vshrl.u32 %v629_v51, 5 }
  0xd3   :  { %v266_v14 = vadd.s32 536870912, %v265_v16  ;;  %v632_v48 = vsub.s32 32, %v631_v17  ;;  %v517_v22 = vand.u32 2139095040, %v2839_v43  ;;  %v486_v23 = vor.u32 %v485_v3, %v484_v39 }
  0xd4   :  { %v489_v27 = vshll.u32 %v488_v10, 23  ;;  %v634_v19 = vshll.u32 %v2551_v60, %v631_v17  ;;  %v637_v31 = vshll.u32 %v2552_v62, %v631_v17  ;;  %v640_v35 = vshll.u32 %v2553_v0, %v631_v17 }
  0xd5   :  { %v2859_v32 = vshrl.u32 %v266_v14, 30  ;;  %v635_v1 = vshrl.u32 %v2552_v62, %v632_v48  ;;  %v638_v30 = vshrl.u32 %v2553_v0, %v632_v48  ;;  %v641_v55 = vshrl.u32 %v3798_v2, %v632_v48 }
  0xd6   :  { %v643_v36 = vshll.u32 %v3798_v2, %v631_v17  ;;  %v644_v44 = vshrl.u32 %v2555_v4, %v632_v48  ;;  %v646_v50 = vshll.u32 %v2555_v4, %v631_v17  ;;  %v647_v41 = vshrl.u32 %v2556_v12, %v632_v48 }
  0xd7   :  { %v268_v46 = vshll.u32 %v2859_v32, 30  ;;  %v636_v52 = vor.u32 %v635_v1, %v634_v19  ;;  %v639_v59 = vor.u32 %v638_v30, %v637_v31  ;;  %v490_v54 = vor.u32 4788187, %v489_v27 }
  0xd8   :  { %v642_v63 = vor.u32 %v641_v55, %v640_v35  ;;  %v645_v5 = vor.u32 %v644_v44, %v643_v36  ;;  %vm649_vm12 = vcmp.lt.s32.totalorder %v630_v20, 1  ;;  %v633_v8 = vshrl.u32 %v2551_v60, %v632_v48 }
  0xd9   :  { %v2870_v7 = vsub.s32 %v265_v16, %v268_v46  ;;  %v648_v9 = vor.u32 %v647_v41, %v646_v50  ;;  %vm652_vm13 = vcmp.lt.s32.totalorder %v630_v20, 4  ;;  %vm651_vm14 = vcmp.lt.s32.totalorder %v630_v20, 3  ;;  %v69_v46 = vpop.permute.xlu0 %68 }
  0xda   :  { %v654_v53 = vsel %vm652_vm13, %v642_v63, 2102212464  ;;  %v657_v49 = vsel %vm649_vm12, %v636_v52, %v639_v59  ;;  %v658_v51 = vsel %vm652_vm13, %v645_v5, 920167782  ;;  %vm650_vm15 = vcmp.lt.s32.totalorder %v630_v20, 2 }
  0xdb   :  { %v271_v45 = vsub.s32 0, %v2870_v7  ;;  %v659_v3 = vsel %vm651_vm14, %v642_v63, %v658_v51  ;;  %v661_v10 = vsel %vm649_vm12, %v639_v59, %v642_v63  ;;  %vm310_vm0 = vcmp.lt.s32.totalorder %v2618_v24, 0 }
  0xdc   :  { %v653_v6 = vsel %vm649_vm12, %v633_v8, %v636_v52  ;;  %v655_v17 = vsel %vm651_vm14, %v639_v59, %v654_v53  ;;  %v660_v16 = vsel %vm650_vm15, %v657_v49, %v659_v3  ;;  %v662_v39 = vsel %vm652_vm13, %v648_v9, 1326507024 }
  0xdd   :  { %vm104_vm1 = vcmp.lt.s32.totalorder %v2621_v25, 0  ;;  %v2332_v14 = vmin.u32 %v271_v45, %v2870_v7  ;;  %v663_v48 = vsel %vm651_vm14, %v645_v5, %v662_v39  ;;  %v392_v31 = vxor.u32 2147483648, %v2845_v13 }
  0xde   :  { %v2879_v27 = vmul.u32.u64.low %v2850_v33, %v660_v16  ;;  %v2880_v19 = vmul.u32.u64.high %v2850_v33, %v660_v16, %v2879_v27  ;;  %v491_v1 = vand.u32 2147483647, %v490_v54  ;;  %v664_v30 = vsel %vm650_vm15, %v661_v10, %v663_v48 }
  0xdf   :  { %v518_v35 = vshrl.u32 %v517_v22, 23  ;;  %v273_v55 = vclz %v2332_v14  ;;  %v2886_v36 = vmul.u32.u64.low %v2850_v33, %v664_v30  ;;  %v2887_v44 = vmul.u32.u64.high %v2850_v33, %v664_v30, %v2886_v36 }
  0xe0   :  { %v521_v50 = vand.u32 8388607, %v3792_v58  ;;  %v493_v52 = vcvt.s32.f32 %v486_v23  ;;  %v656_v59 = vsel %vm650_vm15, %v653_v6, %v655_v17  ;;  %v826_v63 = vand.u32 2139095040, %v2854_v18  ;;  %v84_v6 = vpop.permute.xlu1 %83 }
  0xe1   :  { %v2343_v41 = vadd.s32 4294967169, %v518_v35  ;;  %v186_v54 = vxor.u32 2147483648, %v2847_v56  ;;  %v2333_v5 = vadd.s32 4294967294, %v273_v55  ;;  %v675_v22 = vadd.s32 1, %v2880_v19 }
  0xe2   :  { %v3788_v8 = vand.u32 2147483647, %v2854_v18  ;;  %v2896_v9 = vmul.f32 %v493_v52, %v491_v1  ;;  %v827_v49 = vshrl.u32 %v826_v63, 23  ;;  %v2899_v51 = vmul.f32 %v2615_v21, %v69_v46 }
  0xe3   :  { %v524_v53 = vadd.s32 1, %v2343_v41  ;;  %vm2334_vm2 = vcmp.lt.s32.totalorder %v2333_v5, 0  ;;  %v672_v20 = vmul.u32 %v2850_v33, %v656_v59  ;;  %vm674_vm3 = vc.u32 %v2887_v44, %v2879_v27 }
  0xe4   :  { %v522_v23 = vor.u32 8388608, %v521_v50  ;;  %v276_v45 = vsel %vm2334_vm2, 0, %v2333_v5  ;;  %v676_v3 = vsel %vm674_vm3, %v675_v22, %v2880_v19  ;;  %v2355_v10 = vadd.s32 4294967169, %v827_v49 }
  0xe5   :  { %vm525_vm4 = vcmp.gt.s32.totalorder %v524_v53, 0  ;;  %v2908_v17 = vsel %vm310_vm0, %v392_v31, %v2845_v13  ;;  %v281_v16 = vsub.s32 4294967266, %v276_v45  ;;  %v677_v39 = vadd.s32 %v676_v3, %v672_v20 }
  0xe6   :  { %v2912_v33 = vand.u32 8388607, %v3788_v8  ;;  %v2917_v14 = vsel %vm104_vm1, %v186_v54, %v2847_v56  ;;  %v277_v48 = vsub.s32 32, %v276_v45  ;;  %v526_v19 = vsel %vm525_vm4, %v524_v53, 0 }
  0xe7   :  { %v833_v1 = vadd.s32 1, %v2355_v10  ;;  %v261_v30 = vadd.s32 %v2823_v29, %v2829_v42  ;;  %v282_v35 = vadd.s32 127, %v281_v16  ;;  %v678_v13 = vadd.s32 536870912, %v677_v39 }
  0xe8   :  { %v2922_v31 = vmul.f32 %v2615_v21, %v84_v6  ;;  %v495_v55 = vxor.u32 2147483648, %v2896_v9  ;;  %v528_v36 = vand.u32 31, %v526_v19  ;;  %v2925_v50 = vshll.u32 %v522_v23, 8 }
  0xe9   :  { %v3790_v46 = vand.u32 2147483647, %v2899_v51  ;;  %v278_v56 = vshll.u32 %v2870_v7, %v276_v45  ;;  %v2929_v52 = vshrl.u32 %v678_v13, 30  ;;  %v831_v59 = vor.u32 8388608, %v2912_v33 }
  0xea   :  { %v723_v29 = vand.u32 2139095040, %v2899_v51  ;;  %v279_v42 = vshrl.u32 %v261_v30, %v277_v48  ;;  %v527_v41 = vshrl.u32 %v526_v19, 5  ;;  %v529_v63 = vsub.s32 32, %v528_v36 }
  0xeb   :  { %vm834_vm5 = vcmp.gt.s32.totalorder %v833_v1, 0  ;;  %v283_v21 = vshll.u32 %v282_v35, 23  ;;  %v680_v54 = vshll.u32 %v2929_v52, 30  ;;  %v531_v5 = vshll.u32 %v2551_v60, %v528_v36 }
  0xec   :  { %v534_v22 = vshll.u32 %v2552_v62, %v528_v36  ;;  %v532_v53 = vshrl.u32 %v2552_v62, %v529_v63  ;;  %v535_v7 = vshrl.u32 %v2553_v0, %v529_v63  ;;  %v537_v49 = vshll.u32 %v2553_v0, %v528_v36 }
  0xed   :  { %v538_v20 = vshrl.u32 %v3798_v2, %v529_v63  ;;  %v2940_v23 = vsub.s32 %v677_v39, %v680_v54  ;;  %v540_v45 = vshll.u32 %v3798_v2, %v528_v36  ;;  %v541_v3 = vshrl.u32 %v2555_v4, %v529_v63 }
  0xee   :  { %v543_v10 = vshll.u32 %v2555_v4, %v528_v36  ;;  %v533_v6 = vor.u32 %v532_v53, %v531_v5  ;;  %v536_v16 = vor.u32 %v535_v7, %v534_v22  ;;  %v544_v48 = vshrl.u32 %v2556_v12, %v529_v63 }
  0xef   :  { %v539_v33 = vor.u32 %v538_v20, %v537_v49  ;;  %v280_v19 = vor.u32 %v279_v42, %v278_v56  ;;  %v683_v30 = vsub.s32 0, %v2940_v23  ;;  %v542_v35 = vor.u32 %v541_v3, %v540_v45 }
  0xf0   :  { %vm546_vm6 = vcmp.lt.s32.totalorder %v527_v41, 1  ;;  %v284_v13 = vor.u32 4788187, %v283_v21  ;;  %v530_v39 = vshrl.u32 %v2551_v60, %v529_v63  ;;  %v545_v54 = vor.u32 %v544_v48, %v543_v10 }
  0xf1   :  { %vm549_vm7 = vcmp.lt.s32.totalorder %v527_v41, 4  ;;  %v2348_v8 = vmin.u32 %v683_v30, %v2940_v23  ;;  %vm547_vm8 = vcmp.lt.s32.totalorder %v527_v41, 2  ;;  %v554_v36 = vsel %vm546_vm6, %v533_v6, %v536_v16 }
  0xf2   :  { %v551_v11 = vsel %vm549_vm7, %v539_v33, 2102212464  ;;  %vm548_vm9 = vcmp.lt.s32.totalorder %v527_v41, 3  ;;  %v555_v5 = vsel %vm549_vm7, %v542_v35, 920167782  ;;  %v558_v22 = vsel %vm546_vm6, %v536_v16, %v539_v33 }
  0xf3   :  { %v559_v53 = vsel %vm549_vm7, %v545_v54, 1326507024  ;;  %v685_v7 = vclz %v2348_v8  ;;  %v550_v56 = vsel %vm546_vm6, %v530_v39, %v533_v6  ;;  %v552_v42 = vsel %vm548_vm9, %v536_v16, %v551_v11 }
  0xf4   :  { %v556_v49 = vsel %vm548_vm9, %v539_v33, %v555_v5  ;;  %v285_v20 = vand.u32 2147483647, %v284_v13  ;;  %v560_v45 = vsel %vm548_vm9, %v542_v35, %v559_v53  ;;  %v835_v63 = vsel %vm834_vm5, %v833_v1, 0 }
  0xf5   :  { %v557_v21 = vsel %vm547_vm8, %v554_v36, %v556_v49  ;;  %v2349_v3 = vadd.s32 4294967294, %v685_v7  ;;  %v561_v10 = vsel %vm547_vm8, %v558_v22, %v560_v45  ;;  %v553_v54 = vsel %vm547_vm8, %v550_v56, %v552_v42 }
  0xf6   :  { %v2953_v48 = vmul.u32.u64.low %v2925_v50, %v557_v21  ;;  %v2954_v30 = vmul.u32.u64.high %v2925_v50, %v557_v21, %v2953_v48  ;;  %v2959_v8 = vmul.u32.u64.low %v2925_v50, %v561_v10  ;;  %v2960_v11 = vmul.u32.u64.high %v2925_v50, %v561_v10, %v2959_v8 }
  0xf7   :  { %v837_v6 = vand.u32 31, %v835_v63  ;;  %v287_v16 = vcvt.s32.f32 %v280_v19  ;;  %v673_v33 = vadd.s32 %v2879_v27, %v2887_v44  ;;  %vm2350_vm10 = vcmp.lt.s32.totalorder %v2349_v3, 0 }
  0xf8   :  { %v2964_v1 = vshll.u32 %v831_v59, 8  ;;  %v688_v35 = vsel %vm2350_vm10, 0, %v2349_v3  ;;  %v724_v39 = vshrl.u32 %v723_v29, 23  ;;  %v2968_v36 = vand.u32 8388607, %v3790_v46 }
  0xf9   :  { %v838_v13 = vsub.s32 32, %v837_v6  ;;  %v2970_v41 = vmul.f32 %v287_v16, %v285_v20  ;;  %v693_v5 = vsub.s32 4294967266, %v688_v35  ;;  %v569_v22 = vmul.u32 %v2925_v50, %v553_v54 }
  0xfa   :  { %v572_v19 = vadd.s32 1, %v2954_v30  ;;  %vm571_vm11 = vc.u32 %v2960_v11, %v2953_v48  ;;  %v840_v27 = vshll.u32 %v2551_v60, %v837_v6  ;;  %v843_v59 = vshll.u32 %v2552_v62, %v837_v6 }
  0xfb   :  { %v841_v44 = vshrl.u32 %v2552_v62, %v838_v13  ;;  %v689_v29 = vsub.s32 32, %v688_v35  ;;  %v694_v53 = vadd.s32 127, %v693_v5  ;;  %v844_v56 = vshrl.u32 %v2553_v0, %v838_v13 }
  0xfc   :  { %v573_v7 = vsel %vm571_vm11, %v572_v19, %v2954_v30  ;;  %v836_v49 = vshrl.u32 %v835_v63, 5  ;;  %v846_v50 = vshll.u32 %v2553_v0, %v837_v6  ;;  %v847_v20 = vshrl.u32 %v3798_v2, %v838_v13 }
  0xfd   :  { %v574_v42 = vadd.s32 %v573_v7, %v569_v22  ;;  %v695_v21 = vshll.u32 %v694_v53, 23  ;;  %v842_v45 = vor.u32 %v841_v44, %v840_v27  ;;  %v845_v3 = vor.u32 %v844_v56, %v843_v59 }
  0xfe   :  { %v2351_v10 = vadd.s32 4294967169, %v724_v39  ;;  %v848_v8 = vor.u32 %v847_v20, %v846_v50  ;;  %v849_v16 = vshll.u32 %v3798_v2, %v837_v6  ;;  %v850_v5 = vshrl.u32 %v2555_v4, %v838_v13 }
  0xff   :  { %v575_v54 = vadd.s32 536870912, %v574_v42  ;;  %v690_v30 = vshll.u32 %v2940_v23, %v688_v35  ;;  %v691_v19 = vshrl.u32 %v673_v33, %v689_v29  ;;  %v852_v22 = vshll.u32 %v2555_v4, %v837_v6 }
 0x100   :  { %v853_v63 = vshrl.u32 %v2556_v12, %v838_v13  ;;  %vm413_vm12 = vcmp.lt.s32.totalorder %v2632_v34, 0  ;;  %v696_v7 = vor.u32 4788187, %v695_v21  ;;  %v839_v39 = vshrl.u32 %v2551_v60, %v838_v13 }
 0x101   :  { %v2989_v53 = vshrl.u32 %v575_v54, 30  ;;  %v851_v27 = vor.u32 %v850_v5, %v849_v16  ;;  %vm855_vm13 = vcmp.lt.s32.totalorder %v836_v49, 1  ;;  %vm857_vm14 = vcmp.lt.s32.totalorder %v836_v49, 3 }
 0x102   :  { %v854_v44 = vor.u32 %v853_v63, %v852_v22  ;;  %vm858_vm15 = vcmp.lt.s32.totalorder %v836_v49, 4  ;;  %v863_v33 = vsel %vm855_vm13, %v842_v45, %v845_v3  ;;  %v692_v6 = vor.u32 %v691_v19, %v690_v30 }
 0x103   :  { %v577_v59 = vshll.u32 %v2989_v53, 30  ;;  %v860_v23 = vsel %vm858_vm15, %v848_v8, 2102212464  ;;  %v864_v35 = vsel %vm858_vm15, %v851_v27, 920167782  ;;  %vm856_vm2 = vcmp.lt.s32.totalorder %v836_v49, 2 }
 0x104   :  { %v865_v29 = vsel %vm857_vm14, %v848_v8, %v864_v35  ;;  %v867_v56 = vsel %vm855_vm13, %v845_v3, %v848_v8  ;;  %v859_v20 = vsel %vm855_vm13, %v839_v39, %v842_v45  ;;  %v868_v13 = vsel %vm858_vm15, %v854_v44, 1326507024  ;;  %v79_v35 = vpop.permute.xlu0 %78 }
 0x105   :  { %v2993_v50 = vsub.s32 %v574_v42, %v577_v59  ;;  %v866_v21 = vsel %vm856_vm2, %v863_v33, %v865_v29  ;;  %v861_v54 = vsel %vm857_vm14, %v845_v3, %v860_v23  ;;  %v869_v16 = vsel %vm857_vm14, %v851_v27, %v868_v13  ;;  %v2501_v13 = vld [vmem:[%s3785_s1] ss:$0 sm:$0xff]  ;;  %s2557_s1 = smov 64  }
 0x106   :  { %v2997_v5 = vmul.u32.u64.low %v2964_v1, %v866_v21  ;;  %v2998_v22 = vmul.u32.u64.high %v2964_v1, %v866_v21, %v2997_v5  ;;  %v697_v63 = vand.u32 2147483647, %v696_v7  ;;  %v870_v30 = vsel %vm856_vm2, %v867_v56, %v869_v16 }
 0x107   :  { %v580_v46 = vsub.s32 0, %v2993_v50  ;;  %v730_v19 = vadd.s32 1, %v2351_v10  ;;  %v3004_v42 = vmul.u32.u64.low %v2964_v1, %v870_v30  ;;  %v3005_v8 = vmul.u32.u64.high %v2964_v1, %v870_v30, %v3004_v42 }
 0x108   :  { %v728_v45 = vor.u32 8388608, %v2968_v36  ;;  %v3791_v3 = vand.u32 2147483647, %v2922_v31  ;;  %v699_v39 = vcvt.s32.f32 %v692_v6  ;;  %v862_v44 = vsel %vm856_vm2, %v859_v20, %v861_v54 }
 0x109   :  { %v2344_v27 = vmin.u32 %v580_v46, %v2993_v50  ;;  %vm731_vm3 = vcmp.gt.s32.totalorder %v730_v19, 0  ;;  %v3016_v10 = vsel %vm413_vm12, %v495_v55, %v2896_v9  ;;  %v289_v7 = vxor.u32 2147483648, %v2970_v41 }
 0x10a   :  { %v881_v59 = vadd.s32 1, %v2998_v22  ;;  %v732_v36 = vsel %vm731_vm3, %v730_v19, 0  ;;  %v3020_v23 = vmul.f32 %v699_v39, %v697_v63  ;;  %v570_v46 = vadd.s32 %v2953_v48, %v2960_v11 }
 0x10b   :  { %v582_v49 = vclz %v2344_v27  ;;  %v734_v33 = vand.u32 31, %v732_v36  ;;  %v878_v6 = vmul.u32 %v2964_v1, %v862_v44  ;;  %vm880_vm4 = vc.u32 %v3005_v8, %v2997_v5 }
 0x10c   :  { %v3027_v9 = vshll.u32 %v728_v45, 8  ;;  %v1032_v55 = vand.u32 2139095040, %v2922_v31  ;;  %v882_v56 = vsel %vm880_vm4, %v881_v59, %v2998_v22  ;;  %v3033_v21 = vand.u32 8388607, %v3791_v3 }
 0x10d   :  { %v2345_v29 = vadd.s32 4294967294, %v582_v49  ;;  %v735_v20 = vsub.s32 32, %v734_v33  ;;  %v883_v48 = vadd.s32 %v882_v56, %v878_v6  ;;  %v737_v11 = vshll.u32 %v2551_v60, %v734_v33 }
 0x10e   :  { %v740_v1 = vshll.u32 %v2552_v62, %v734_v33  ;;  %v3040_v54 = vmul.f32 %v2501_v13, %v79_v35  ;;  %v743_v63 = vshll.u32 %v2553_v0, %v734_v33  ;;  %v733_v44 = vshrl.u32 %v732_v36, 5 }
 0x10f   :  { %vm2346_vm5 = vcmp.lt.s32.totalorder %v2345_v29, 0  ;;  %v738_v16 = vshrl.u32 %v2552_v62, %v735_v20  ;;  %v741_v22 = vshrl.u32 %v2553_v0, %v735_v20  ;;  %v884_v19 = vadd.s32 536870912, %v883_v48 }
 0x110   :  { %v585_v30 = vsel %vm2346_vm5, 0, %v2345_v29  ;;  %v744_v42 = vshrl.u32 %v3798_v2, %v735_v20  ;;  %v747_v45 = vshrl.u32 %v2555_v4, %v735_v20  ;;  %v746_v59 = vshll.u32 %v3798_v2, %v734_v33 }
 0x111   :  { %v586_v39 = vsub.s32 32, %v585_v30  ;;  %v590_v27 = vsub.s32 4294967266, %v585_v30  ;;  %v3048_v49 = vshrl.u32 %v884_v19, 30  ;;  %v739_v35 = vor.u32 %v738_v16, %v737_v11 }
 0x112   :  { %v742_v6 = vor.u32 %v741_v22, %v740_v1  ;;  %v745_v56 = vor.u32 %v744_v42, %v743_v63  ;;  %v748_v3 = vor.u32 %v747_v45, %v746_v59  ;;  %v749_v58 = vshll.u32 %v2555_v4, %v734_v33 }
 0x113   :  { %v591_v13 = vadd.s32 127, %v590_v27  ;;  %v750_v29 = vshrl.u32 %v2556_v12, %v735_v20  ;;  %vm207_vm6 = vcmp.lt.s32.totalorder %v2641_v47, 0  ;;  %v588_v37 = vshrl.u32 %v570_v46, %v586_v39 }
 0x114   :  { %v886_v40 = vshll.u32 %v3048_v49, 30  ;;  %v736_v36 = vshrl.u32 %v2551_v60, %v735_v20  ;;  %v1033_v26 = vshrl.u32 %v1032_v55, 23  ;;  %vm752_vm7 = vcmp.lt.s32.totalorder %v733_v44, 1 }
 0x115   :  { %v592_v28 = vshll.u32 %v591_v13, 23  ;;  %v751_v19 = vor.u32 %v750_v29, %v749_v58  ;;  %vm755_vm8 = vcmp.lt.s32.totalorder %v733_v44, 4  ;;  %v587_v11 = vshll.u32 %v2993_v50, %v585_v30 }
 0x116   :  { %v3056_v1 = vsub.s32 %v883_v48, %v886_v40  ;;  %v757_v33 = vsel %vm755_vm8, %v745_v56, 2102212464  ;;  %v760_v16 = vsel %vm752_vm7, %v739_v35, %v742_v6  ;;  %vm753_vm9 = vcmp.lt.s32.totalorder %v733_v44, 2 }
 0x117   :  { %v593_v22 = vor.u32 4788187, %v592_v28  ;;  %vm754_vm10 = vcmp.lt.s32.totalorder %v733_v44, 3  ;;  %v761_v46 = vsel %vm755_vm8, %v748_v3, 920167782  ;;  %v589_v63 = vor.u32 %v588_v37, %v587_v11 }
 0x118   :  { %v889_v20 = vsub.s32 0, %v3056_v1  ;;  %v762_v55 = vsel %vm754_vm10, %v745_v56, %v761_v46  ;;  %v764_v42 = vsel %vm752_vm7, %v742_v6, %v745_v56  ;;  %v756_v58 = vsel %vm752_vm7, %v736_v36, %v739_v35 }
 0x119   :  { %v758_v45 = vsel %vm754_vm10, %v742_v6, %v757_v33  ;;  %v763_v39 = vsel %vm753_vm9, %v760_v16, %v762_v55  ;;  %v765_v40 = vsel %vm755_vm8, %v751_v19, 1326507024  ;;  %v594_v27 = vand.u32 2147483647, %v593_v22 }
 0x11a   :  { %v2356_v50 = vmin.u32 %v889_v20, %v3056_v1  ;;  %v766_v48 = vsel %vm754_vm10, %v748_v3, %v765_v40  ;;  %v3065_v28 = vmul.u32.u64.low %v3027_v9, %v763_v39  ;;  %v3066_v30 = vmul.u32.u64.high %v3027_v9, %v763_v39, %v3065_v28 }
 0x11b   :  { %v767_v37 = vsel %vm753_vm9, %v764_v42, %v766_v48  ;;  %v2363_v59 = vadd.s32 4294967169, %v1033_v26  ;;  %v1037_v56 = vor.u32 8388608, %v3033_v21  ;;  %v759_v6 = vsel %vm753_vm9, %v756_v58, %v758_v45 }
 0x11c   :  { %v891_v35 = vclz %v2356_v50  ;;  %v3073_v13 = vmul.u32.u64.low %v3027_v9, %v767_v37  ;;  %v3074_v29 = vmul.u32.u64.high %v3027_v9, %v767_v37, %v3073_v13  ;;  %v3081_v3 = vsel %vm207_vm6, %v289_v7, %v2970_v41 }
 0x11d   :  { %v596_v36 = vcvt.s32.f32 %v589_v63  ;;  %v1039_v19 = vadd.s32 1, %v2363_v59  ;;  %v3797_v26 = vand.u32 2147483647, %v3040_v54  ;;  %v879_v44 = vadd.s32 %v2997_v5, %v3005_v8 }
 0x11e   :  { %v2357_v11 = vadd.s32 4294967294, %v891_v35  ;;  %v778_v33 = vadd.s32 1, %v3066_v30  ;;  %v775_v22 = vmul.u32 %v3027_v9, %v759_v6  ;;  %v929_v41 = vand.u32 2139095040, %v3040_v54 }
 0x11f   :  { %v3088_v16 = vmul.f32 %v596_v36, %v594_v27  ;;  %vm1040_vm11 = vcmp.gt.s32.totalorder %v1039_v19, 0  ;;  %vm777_vm14 = vc.u32 %v3074_v29, %v3065_v28  ;;  %v3094_v46 = vshll.u32 %v1037_v56, 8 }
 0x120   :  { %vm2358_vm13 = vcmp.lt.s32.totalorder %v2357_v11, 0  ;;  %v1041_v7 = vsel %vm1040_vm11, %v1039_v19, 0  ;;  %v779_v5 = vsel %vm777_vm14, %v778_v33, %v3066_v30  ;;  %v3099_v20 = vand.u32 8388607, %v3797_v26 }
 0x121   :  { %v894_v63 = vsel %vm2358_vm13, 0, %v2357_v11  ;;  %v1043_v8 = vand.u32 31, %v1041_v7  ;;  %v780_v42 = vadd.s32 %v779_v5, %v775_v22  ;;  %v188_v58 = vsub.s32 4, %v2749_v15 }
 0x122   :  { %v895_v55 = vsub.s32 32, %v894_v63  ;;  %v899_v9 = vsub.s32 4294967266, %v894_v63  ;;  %v1042_v45 = vshrl.u32 %v1041_v7, 5  ;;  %v930_v50 = vshrl.u32 %v929_v41, 23 }
 0x123   :  { %v1044_v39 = vsub.s32 32, %v1043_v8  ;;  %v1046_v40 = vshll.u32 %v2551_v60, %v1043_v8  ;;  %v781_v27 = vadd.s32 536870912, %v780_v42  ;;  %v1049_v37 = vshll.u32 %v2552_v62, %v1043_v8 }
 0x124   :  { %v900_v48 = vadd.s32 127, %v899_v9  ;;  %v1052_v30 = vshll.u32 %v2553_v0, %v1043_v8  ;;  %v897_v59 = vshrl.u32 %v879_v44, %v895_v55  ;;  %v1055_v19 = vshll.u32 %v3798_v2, %v1043_v8 }
 0x125   :  { %v1047_v56 = vshrl.u32 %v2552_v62, %v1044_v39  ;;  %v1050_v35 = vshrl.u32 %v2553_v0, %v1044_v39  ;;  %v1053_v6 = vshrl.u32 %v3798_v2, %v1044_v39  ;;  %v3108_v36 = vshrl.u32 %v781_v27, 30 }
 0x126   :  { %v901_v13 = vshll.u32 %v900_v48, 23  ;;  %v1056_v11 = vshrl.u32 %v2555_v4, %v1044_v39  ;;  %v896_v33 = vshll.u32 %v3056_v1, %v894_v63  ;;  %v1045_v5 = vshrl.u32 %v2551_v60, %v1044_v39 }
 0x127   :  { %v1048_v22 = vor.u32 %v1047_v56, %v1046_v40  ;;  %v1051_v41 = vor.u32 %v1050_v35, %v1049_v37  ;;  %v1054_v7 = vor.u32 %v1053_v6, %v1052_v30  ;;  %v783_v44 = vshll.u32 %v3108_v36, 30 }
 0x128   :  { %v1057_v55 = vor.u32 %v1056_v11, %v1055_v19  ;;  %v934_v9 = vor.u32 8388608, %v3099_v20  ;;  %v898_v26 = vor.u32 %v897_v59, %v896_v33  ;;  %v902_v48 = vor.u32 4788187, %v901_v13 }
 0x129   :  { %v1058_v27 = vshll.u32 %v2555_v4, %v1043_v8  ;;  %v1059_v21 = vshrl.u32 %v2556_v12, %v1044_v39  ;;  %v3118_v2 = vsub.s32 %v780_v42, %v783_v44  ;;  %vm1061_vm15 = vcmp.lt.s32.totalorder %v1042_v45, 1 }
 0x12a   :  { %vm1063_vm2 = vcmp.lt.s32.totalorder %v1042_v45, 3  ;;  %vm1064_vm3 = vcmp.lt.s32.totalorder %v1042_v45, 4  ;;  %v1069_v40 = vsel %vm1061_vm15, %v1048_v22, %v1051_v41  ;;  %vm1062_vm4 = vcmp.lt.s32.totalorder %v1042_v45, 2 }
 0x12b   :  { %v1060_v1 = vor.u32 %v1059_v21, %v1058_v27  ;;  %v1066_v63 = vsel %vm1064_vm3, %v1054_v7, 2102212464  ;;  %v1070_v37 = vsel %vm1064_vm3, %v1057_v55, 920167782  ;;  %v786_v30 = vsub.s32 0, %v3118_v2 }
 0x12c   :  { %v1065_v56 = vsel %vm1061_vm15, %v1045_v5, %v1048_v22  ;;  %v1071_v20 = vsel %vm1063_vm2, %v1054_v7, %v1070_v37  ;;  %v1067_v59 = vsel %vm1063_vm2, %v1051_v41, %v1066_v63  ;;  %v1073_v35 = vsel %vm1061_vm15, %v1051_v41, %v1054_v7 }
 0x12d   :  { %v1072_v8 = vsel %vm1062_vm4, %v1069_v40, %v1071_v20  ;;  %v1074_v39 = vsel %vm1064_vm3, %v1060_v1, 1326507024  ;;  %v903_v42 = vand.u32 2147483647, %v902_v48  ;;  %v905_v6 = vcvt.s32.f32 %v898_v26 }
 0x12e   :  { %v2352_v13 = vmin.u32 %v786_v30, %v3118_v2  ;;  %v1075_v21 = vsel %vm1063_vm2, %v1057_v55, %v1074_v39  ;;  %v3126_v11 = vmul.u32.u64.low %v3094_v46, %v1072_v8  ;;  %v3127_v33 = vmul.u32.u64.high %v3094_v46, %v1072_v8, %v3126_v11 }
 0x12f   :  { %v1076_v19 = vsel %vm1062_vm4, %v1073_v35, %v1075_v21  ;;  %v2359_v22 = vadd.s32 4294967169, %v930_v50  ;;  %v1068_v5 = vsel %vm1062_vm4, %v1065_v56, %v1067_v59  ;;  %v598_v41 = vxor.u32 2147483648, %v3088_v16 }
 0x130   :  { %v788_v44 = vclz %v2352_v13  ;;  %v3131_v27 = vmul.u32.u64.low %v3094_v46, %v1076_v19  ;;  %v3132_v63 = vmul.u32.u64.high %v3094_v46, %v1076_v19, %v3131_v27  ;;  %v3805_v7 = vand.u32 2147483647, %v2621_v25 }
 0x131   :  { %v936_v26 = vadd.s32 1, %v2359_v22  ;;  %v189_v45 = vsel %vm104_vm1, %v188_v58, %v2749_v15  ;;  %v3140_v55 = vmul.f32 %v905_v6, %v903_v42  ;;  %v776_v50 = vadd.s32 %v3065_v28, %v3074_v29 }
 0x132   :  { %vm103_vm5 = vcmp.le.f32.partialorder %v3805_v7, 0.7853982  ;;  %v2353_v48 = vadd.s32 4294967294, %v788_v44  ;;  %v1084_v40 = vmul.u32 %v3094_v46, %v1068_v5  ;;  %v1087_v37 = vadd.s32 1, %v3127_v33 }
 0x133   :  { %v190_v1 = vsel %vm103_vm5, %v2621_v25, %v2917_v14  ;;  %vm937_vm7 = vcmp.gt.s32.totalorder %v936_v26, 0  ;;  %v3148_v30 = vshll.u32 %v934_v9, 8  ;;  %vm1086_vm1 = vc.u32 %v3132_v63, %v3126_v11 }
 0x134   :  { %vm2354_vm8 = vcmp.lt.s32.totalorder %v2353_v48, 0  ;;  %v938_v15 = vsel %vm937_vm7, %v936_v26, 0  ;;  %v3152_v58 = vsel %vm103_vm5, 0, %v189_v45  ;;  %v1088_v28 = vsel %vm1086_vm1, %v1087_v37, %v3127_v33 }
 0x135   :  { %v791_v56 = vsel %vm2354_vm8, 0, %v2353_v48  ;;  %v940_v29 = vand.u32 31, %v938_v15  ;;  %2461 = vcosq.f32 %v190_v1  ;;  %v1089_v46 = vadd.s32 %v1088_v28, %v1084_v40 }
 0x136   :  { %v792_v14 = vsub.s32 32, %v791_v56  ;;  %v796_v20 = vsub.s32 4294967266, %v791_v56  ;;  %2463 = vsinq.f32 %v190_v1  ;;  %v793_v59 = vshll.u32 %v3118_v2, %v791_v56 }
 0x137   :  { %v939_v9 = vshrl.u32 %v938_v15, 5  ;;  %v941_v8 = vsub.s32 32, %v940_v29  ;;  %v943_v35 = vshll.u32 %v2551_v60, %v940_v29  ;;  %v1090_v6 = vadd.s32 536870912, %v1089_v46 }
 0x138   :  { %v794_v39 = vshrl.u32 %v776_v50, %v792_v14  ;;  %v797_v42 = vadd.s32 127, %v796_v20  ;;  %v946_v13 = vshll.u32 %v2552_v62, %v940_v29  ;;  %v949_v33 = vshll.u32 %v2553_v0, %v940_v29 }
 0x139   :  { %v944_v21 = vshrl.u32 %v2552_v62, %v941_v8  ;;  %v947_v19 = vshrl.u32 %v2553_v0, %v941_v8  ;;  %v3806_v22 = vmov 2102212464   ;;  %v3162_v27 = vshrl.u32 %v1090_v6, 30 }
 0x13a   :  { %v950_v44 = vshrl.u32 %v3806_v22, %v941_v8  ;;  %v798_v5 = vshll.u32 %v797_v42, 23  ;;  %v952_v2 = vshll.u32 %v3806_v22, %v940_v29  ;;  %v953_v26 = vshrl.u32 %v2555_v4, %v941_v8 }
 0x13b   :  { %v945_v7 = vor.u32 %v944_v21, %v943_v35  ;;  %v948_v45 = vor.u32 %v947_v19, %v946_v13  ;;  %v195_v48 = vand.u32 3, %v3152_v58  ;;  %v3167_v1 = vor.u32 %v794_v39, %v793_v59 }
 0x13c   :  { %v951_v50 = vor.u32 %v950_v44, %v949_v33  ;;  %v1092_v62 = vshll.u32 %v3162_v27, 30  ;;  %v942_v0 = vshrl.u32 %v2551_v60, %v941_v8  ;;  %v954_v40 = vor.u32 %v953_v26, %v952_v2 }
 0x13d   :  { %v799_v37 = vor.u32 4788187, %v798_v5  ;;  %v955_v15 = vshll.u32 %v2555_v4, %v940_v29  ;;  %v956_v56 = vshrl.u32 %v2556_v12, %v941_v8  ;;  %vm958_vm9 = vcmp.lt.s32.totalorder %v939_v9, 1 }
 0x13e   :  { %v3173_v28 = vsub.s32 %v1089_v46, %v1092_v62  ;;  %vm960_vm10 = vcmp.lt.s32.totalorder %v939_v9, 3  ;;  %vm961_vm11 = vcmp.lt.s32.totalorder %v939_v9, 4  ;;  %v962_v14 = vsel %vm958_vm9, %v942_v0, %v945_v7 }
 0x13f   :  { %v3176_v20 = vpop.eup %2461  ;;  %v957_v59 = vor.u32 %v956_v56, %v955_v15  ;;  %v963_v35 = vsel %vm961_vm11, %v951_v50, 2102212464  ;;  %v966_v39 = vsel %vm958_vm9, %v945_v7, %v948_v45  ;;  %v967_v60 = vsel %vm961_vm11, %v954_v40, 920167782 }
 0x140   :  { %v3179_v42 = vpop.eup %2463  ;;  %v1095_v4 = vsub.s32 0, %v3173_v28  ;;  %vm959_vm13 = vcmp.lt.s32.totalorder %v939_v9, 2  ;;  %v964_v12 = vsel %vm960_vm10, %v948_v45, %v963_v35  ;;  %v968_v29 = vsel %vm960_vm10, %v951_v50, %v967_v60 }
 0x141   :  { %v965_v46 = vsel %vm959_vm13, %v962_v14, %v964_v12  ;;  %v969_v8 = vsel %vm959_vm13, %v966_v39, %v968_v29  ;;  %v970_v6 = vsel %vm958_vm9, %v948_v45, %v951_v50  ;;  %v971_v13 = vsel %vm961_vm11, %v957_v59, 1326507024 }
 0x142   :  { %v802_v21 = vcvt.s32.f32 %v3167_v1  ;;  %v2364_v19 = vmin.u32 %v1095_v4, %v3173_v28  ;;  %v972_v33 = vsel %vm960_vm10, %v954_v40, %v971_v13  ;;  %vm194_vm14 = vweird.f32 %v2621_v25 }
 0x143   :  { %v800_v22 = vand.u32 2147483647, %v799_v37  ;;  %v973_v44 = vsel %vm959_vm13, %v970_v6, %v972_v33  ;;  %v3190_v5 = vmul.u32.u64.low %v3148_v30, %v969_v8  ;;  %v3191_v2 = vmul.u32.u64.high %v3148_v30, %v969_v8, %v3190_v5 }
 0x144   :  { %vm619_vm15 = vcmp.lt.s32.totalorder %v2770_v61, 0  ;;  %v1097_v26 = vclz %v2364_v19  ;;  %v3196_v7 = vmul.u32.u64.low %v3148_v30, %v973_v44  ;;  %v3197_v45 = vmul.u32.u64.high %v3148_v30, %v973_v44, %v3196_v7 }
 0x145   :  { %v981_v50 = vmul.u32 %v3148_v30, %v965_v46  ;;  %vm196_vm2 = vcmp.lt.s32.totalorder %v195_v48, 2  ;;  %vm197_vm3 = vcmp.eq.s32.totalorder %v195_v48, 0  ;;  %v198_v9 = vxor.u32 2147483648, %v3179_v42 }
 0x146   :  { %v201_v1 = vxor.u32 2147483648, %v3176_v20  ;;  %vm516_vm4 = vcmp.lt.s32.totalorder %v2839_v43, 0  ;;  %v2365_v62 = vadd.s32 4294967294, %v1097_v26  ;;  %vm200_vm5 = vcmp.eq.s32.totalorder %v195_v48, 2 }
 0x147   :  { %vm2172_vm7 = vcmask 523264   ;;  %v394_v0 = vsub.s32 4, %v2721_v38  ;;  %vm825_vm8 = vcmp.lt.s32.totalorder %v2854_v18, 0  ;;  %v984_v40 = vadd.s32 1, %v3191_v2 }
 0x148   :  { %v199_v30 = vsel %vm197_vm3, %v3176_v20, %v198_v9  ;;  %v202_v37 = vsel %vm200_vm5, %v201_v1, %v3179_v42  ;;  %v3807_v15 = vand.u32 2147483647, %v2618_v24  ;;  %vm2366_vm9 = vcmp.lt.s32.totalorder %v2365_v62, 0 }
 0x149   :  { %vm983_vm10 = vc.u32 %v3197_v45, %v3190_v5  ;;  %v203_v14 = vsel %vm196_vm2, %v199_v30, %v202_v37  ;;  %vm722_vm11 = vcmp.lt.s32.totalorder %v2899_v51, 0  ;;  %v1100_v35 = vsel %vm2366_vm9, 0, %v2365_v62 }
 0x14a   :  { %vm3214_vm1 = vcmp.le.f32.partialorder %v3807_v15, 0.7853982  ;;  %v985_v39 = vsel %vm983_vm10, %v984_v40, %v3191_v2  ;;  %v204_v60 = vsel %vm194_vm14, nan, %v203_v14  ;;  %v395_v4 = vsel %vm310_vm0, %v394_v0, %v2721_v38 }
 0x14b   :  { %v396_v59 = vsel %vm3214_vm1, %v2618_v24, %v2908_v17  ;;  %v803_v12 = vmul.f32 %v802_v21, %v800_v22  ;;  %v1101_v48 = vsub.s32 32, %v1100_v35  ;;  %v1105_v29 = vsub.s32 4294967266, %v1100_v35  ;;  %2193 = vrot.lane.b32.xlu0 %v204_v60, %s2557_s1  ;;  %2173 = vst.msk [vmem:[#allocation2] sm:$0xff] %vm2172_vm7, %v204_v60 }
 0x14c   :  { %v986_v46 = vadd.s32 %v985_v39, %v981_v50  ;;  %v907_v17 = vxor.u32 2147483648, %v3140_v55  ;;  %v1085_v8 = vadd.s32 %v3126_v11, %v3132_v63  ;;  %v3239_v6 = vsel %vm3214_vm1, 0, %v395_v4 }
 0x14d   :  { %2465 = vcosq.f32 %v396_v59  ;;  %v1106_v38 = vadd.s32 127, %v1105_v29  ;;  %v3810_v21 = vand.u32 2147483647, %v2641_v47  ;;  %v3813_v33 = vxor.u32 2147483648, %v3020_v23 }
 0x14e   :  { %v987_v13 = vadd.s32 536870912, %v986_v46  ;;  %2467 = vsinq.f32 %v396_v59  ;;  %v1103_v63 = vshrl.u32 %v1085_v8, %v1101_v48  ;;  %v291_v22 = vsub.s32 4, %v2859_v32 }
 0x14f   :  { %vm3243_vm0 = vcmp.le.f32.partialorder %v3810_v21, 0.7853982  ;;  %v3252_v11 = vsel %vm619_vm15, %v3813_v33, %v3020_v23  ;;  %v804_v2 = vxor.u32 2147483648, %v803_v12  ;;  %v1107_v26 = vshll.u32 %v1106_v38, 23 }
 0x150   :  { %v293_v44 = vsel %vm3243_vm0, %v2641_v47, %v3081_v3  ;;  %v3259_v7 = vshrl.u32 %v987_v13, 30  ;;  %v599_v23 = vsel %vm516_vm4, %v598_v41, %v3088_v16  ;;  %v1102_v50 = vshll.u32 %v3173_v28, %v1100_v35 }
 0x151   :  { %2469 = vcosq.f32 %v293_v44  ;;  %v401_v62 = vand.u32 3, %v3239_v6  ;;  %v292_v0 = vsel %vm207_vm6, %v291_v22, %v2859_v32  ;;  %v3274_v3 = vsel %vm825_vm8, %v907_v17, %v3140_v55 }
 0x152   :  { %v1108_v40 = vor.u32 4788187, %v1107_v26  ;;  %v989_v30 = vshll.u32 %v3259_v7, 30  ;;  %v3279_v37 = vsel %vm3243_vm0, 0, %v292_v0  ;;  %v1104_v16 = vor.u32 %v1103_v63, %v1102_v50 }
 0x153   :  { %2471 = vsinq.f32 %v293_v44  ;;  %v3814_v41 = vand.u32 2147483647, %v2632_v34  ;;  %v497_v32 = vsub.s32 4, %v2791_v57  ;;  %v3290_v55 = vsel %vm722_vm11, %v804_v2, %v803_v12 }
 0x154   :  { %v3294_v15 = vadd.s32 %v3190_v5, %v3197_v45  ;;  %v3296_v56 = vsub.s32 %v986_v46, %v989_v30  ;;  %vm3803_vm6 = vweird.f32 %v2618_v24  ;;  %vm402_vm2 = vcmp.lt.s32.totalorder %v401_v62, 2 }
 0x155   :  { %vm3283_vm13 = vcmp.le.f32.partialorder %v3814_v41, 0.7853982  ;;  %v298_v59 = vand.u32 3, %v3279_v37  ;;  %v498_v35 = vsel %vm413_vm12, %v497_v32, %v2791_v57  ;;  %v1109_v39 = vand.u32 2147483647, %v1108_v40 }
 0x156   :  { %v499_v14 = vsel %vm3283_vm13, %v2632_v34, %v3016_v10  ;;  %v992_v5 = vsub.s32 0, %v3296_v56  ;;  %vm403_vm3 = vcmp.eq.s32.totalorder %v401_v62, 0  ;;  %v1111_v60 = vcvt.s32.f32 %v1104_v16 }
 0x157   :  { %2473 = vcosq.f32 %v499_v14  ;;  %v3308_v45 = vpop.eup %2465  ;;  %v3817_v10 = vand.u32 2147483647, %v2839_v43  ;;  %v600_v12 = vsub.s32 4, %v2989_v53  ;;  %v3323_v46 = vsel %vm3283_vm13, 0, %v498_v35 }
 0x158   :  { %2475 = vsinq.f32 %v499_v14  ;;  %v3317_v48 = vpop.eup %2467  ;;  %v2360_v57 = vmin.u32 %v992_v5, %v3296_v56  ;;  %v407_v29 = vxor.u32 2147483648, %v3308_v45  ;;  %vm406_vm12 = vcmp.eq.s32.totalorder %v401_v62, 2 }
 0x159   :  { %vm3312_vm5 = vcmp.le.f32.partialorder %v3817_v10, 0.7853982  ;;  %v404_v8 = vxor.u32 2147483648, %v3317_v48  ;;  %vm3804_vm1 = vweird.f32 %v2641_v47  ;;  %vm299_vm9 = vcmp.lt.s32.totalorder %v298_v59, 2 }
 0x15a   :  { %v602_v17 = vsel %vm3312_vm5, %v2839_v43, %v599_v23  ;;  %vm300_vm10 = vcmp.eq.s32.totalorder %v298_v59, 0  ;;  %v3332_v13 = vmul.f32 %v1111_v60, %v1109_v39  ;;  %v994_v21 = vclz %v2360_v57 }
 0x15b   :  { %v3330_v38 = vpop.eup %2469  ;;  %v408_v19 = vsel %vm406_vm12, %v407_v29, %v3317_v48  ;;  %v601_v33 = vsel %vm516_vm4, %v600_v12, %v2989_v53  ;;  %v405_v63 = vsel %vm403_vm3, %v3308_v45, %v404_v8  ;;  %v504_v44 = vand.u32 3, %v3323_v46 }
 0x15c   :  { %v304_v22 = vxor.u32 2147483648, %v3330_v38  ;;  %2477 = vcosq.f32 %v602_v17  ;;  %v2361_v2 = vadd.s32 4294967294, %v994_v21  ;;  %v409_v26 = vsel %vm402_vm2, %v405_v63, %v408_v19 }
 0x15d   :  { %v3349_v23 = vsel %vm3312_vm5, 0, %v601_v33  ;;  %2479 = vsinq.f32 %v602_v17  ;;  %v3351_v50 = vpop.eup %2471  ;;  %v410_v53 = vsel %vm3803_vm6, nan, %v409_v26  ;;  %vm303_vm4 = vcmp.eq.s32.totalorder %v298_v59, 2 }
 0x15e   :  { %vm3802_vm0 = vweird.f32 %v2632_v34  ;;  %v3820_v0 = vand.u32 2147483647, %v2770_v61  ;;  %v703_v62 = vsub.s32 4, %v2929_v52  ;;  %vm2362_vm2 = vcmp.lt.s32.totalorder %v2361_v2, 0  ;;  %2175 = vst.msk [vmem:[#allocation2 + $0x10] sm:$0xff] %vm2172_vm7, %v410_v53  ;;  %2197 = vrot.lane.b32.xlu0 %v410_v53, %s2557_s1 }
 0x15f   :  { %v301_v30 = vxor.u32 2147483648, %v3351_v50  ;;  %v305_v16 = vsel %vm303_vm4, %v304_v22, %v3351_v50  ;;  %v1113_v28 = vxor.u32 2147483648, %v3332_v13  ;;  %v997_v32 = vsel %vm2362_vm2, 0, %v2361_v2 }
 0x160   :  { %vm3358_vm13 = vcmp.le.f32.partialorder %v3820_v0, 0.7853982  ;;  %vm509_vm3 = vcmp.eq.s32.totalorder %v504_v44, 2  ;;  %v607_v14 = vand.u32 3, %v3349_v23  ;;  %v998_v39 = vsub.s32 32, %v997_v32 }
 0x161   :  { %v705_v41 = vsel %vm3358_vm13, %v2770_v61, %v3252_v11  ;;  %v3375_v35 = vpop.eup %2473  ;;  %v999_v5 = vshll.u32 %v3296_v56, %v997_v32  ;;  %v1002_v60 = vsub.s32 4294967266, %v997_v32  ;;  %v302_v10 = vsel %vm300_vm10, %v3330_v38, %v301_v30 }
 0x162   :  { %v3382_v4 = vpop.eup %2475  ;;  %v306_v11 = vsel %vm299_vm9, %v302_v10, %v305_v16  ;;  %v510_v12 = vxor.u32 2147483648, %v3375_v35  ;;  %v704_v57 = vsel %vm619_vm15, %v703_v62, %v2929_v52  ;;  %2481 = vcosq.f32 %v705_v41 }
 0x163   :  { %vm1031_vm5 = vcmp.lt.s32.totalorder %v2922_v31, 0  ;;  %v1000_v56 = vshrl.u32 %v3294_v15, %v998_v39  ;;  %v1003_v17 = vadd.s32 127, %v1002_v60  ;;  %v307_v21 = vsel %vm3804_vm1, nan, %v306_v11 }
 0x164   :  { %v507_v19 = vxor.u32 2147483648, %v3382_v4  ;;  %2195 = vrot.lane.b32.xlu1 %v307_v21, %s2557_s1  ;;  %2174 = vst.msk [vmem:[#allocation2 + $0x8] sm:$0xff] %vm2172_vm7, %v307_v21  ;;  %vm505_vm12 = vcmp.lt.s32.totalorder %v504_v44, 2  ;;  %vm506_vm9 = vcmp.eq.s32.totalorder %v504_v44, 0  ;;  %v511_v52 = vsel %vm509_vm3, %v510_v12, %v3382_v4 }
 0x165   :  { %2483 = vsinq.f32 %v705_v41  ;;  %v1001_v59 = vor.u32 %v1000_v56, %v999_v5  ;;  %v1004_v15 = vshll.u32 %v1003_v17, 23  ;;  %v3405_v63 = vsel %vm3358_vm13, 0, %v704_v57 }
 0x166   :  { %v508_v33 = vsel %vm506_vm9, %v3375_v35, %v507_v19  ;;  %v3407_v2 = vpop.eup %2477  ;;  %vm928_vm15 = vcmp.lt.s32.totalorder %v3040_v54, 0  ;;  %vm3801_vm10 = vweird.f32 %v2839_v43  ;;  %vm609_vm4 = vcmp.eq.s32.totalorder %v607_v14, 0 }
 0x167   :  { %v512_v26 = vsel %vm505_vm12, %v508_v33, %v511_v52  ;;  %v806_v44 = vsub.s32 4, %v3108_v36  ;;  %v3412_v53 = vpop.eup %2479  ;;  %v1005_v0 = vor.u32 4788187, %v1004_v15  ;;  %vm612_vm2 = vcmp.eq.s32.totalorder %v607_v14, 2 }
 0x168   :  { %v513_v62 = vsel %vm3802_vm0, nan, %v512_v26  ;;  %v613_v40 = vxor.u32 2147483648, %v3407_v2  ;;  %v1008_v16 = vcvt.s32.f32 %v1001_v59  ;;  %v610_v41 = vxor.u32 2147483648, %v3412_v53 }
 0x169   :  { %2176 = vst.msk [vmem:[#allocation2 + $0x18] sm:$0xff] %vm2172_vm7, %v513_v62  ;;  %2199 = vrot.lane.b32.xlu1 %v513_v62, %s2557_s1  ;;  %v710_v32 = vand.u32 3, %v3405_v63  ;;  %v3823_v39 = vand.u32 2147483647, %v2899_v51  ;;  %v1006_v5 = vand.u32 2147483647, %v1005_v0  ;;  %v807_v10 = vsel %vm722_vm11, %v806_v44, %v3108_v36 }
 0x16a   :  { %v614_v60 = vsel %vm612_vm2, %v613_v40, %v3412_v53  ;;  %vm608_vm3 = vcmp.lt.s32.totalorder %v607_v14, 2  ;;  %v611_v57 = vsel %vm609_vm4, %v3407_v2, %v610_v41  ;;  %v3824_v52 = vand.u32 2147483647, %v2854_v18 }
 0x16b   :  { %vm721_vm13 = vcmp.le.f32.partialorder %v3823_v39, 0.7853982  ;;  %v1009_v17 = vmul.f32 %v1008_v16, %v1006_v5  ;;  %v615_v21 = vsel %vm608_vm3, %v611_v57, %v614_v60  ;;  %v909_v15 = vsub.s32 4, %v3048_v49 }
 0x16c   :  { %v808_v11 = vsel %vm721_vm13, %v2899_v51, %v3290_v55  ;;  %v3435_v56 = vsel %vm721_vm13, 0, %v807_v10  ;;  %vm3439_vm12 = vcmp.le.f32.partialorder %v3824_v52, 0.7853982  ;;  %v3443_v36 = vpop.eup %2481  ;;  %v1114_v55 = vsel %vm1031_vm5, %v1113_v28, %v3332_v13 }
 0x16d   :  { %2485 = vcosq.f32 %v808_v11  ;;  %v616_v14 = vsel %vm3801_vm10, nan, %v615_v21  ;;  %v911_v33 = vsel %vm3439_vm12, %v2854_v18, %v3274_v3  ;;  %v1010_v26 = vxor.u32 2147483648, %v1009_v17 }
 0x16e   :  { %2487 = vsinq.f32 %v808_v11  ;;  %2201 = vrot.lane.b32.xlu0 %v616_v14, %s2557_s1  ;;  %2177 = vst.msk [vmem:[#allocation2 + $0x20] sm:$0xff] %vm2172_vm7, %v616_v14  ;;  %vm3800_vm11 = vweird.f32 %v2770_v61  ;;  %vm715_vm9 = vcmp.eq.s32.totalorder %v710_v32, 2  ;;  %v716_v13 = vxor.u32 2147483648, %v3443_v36 }
 0x16f   :  { %v3459_v28 = vpop.eup %2483  ;;  %v813_v44 = vand.u32 3, %v3435_v56  ;;  %v910_v0 = vsel %vm825_vm8, %v909_v15, %v3048_v49  ;;  %2489 = vcosq.f32 %v911_v33  ;;  %v3827_v3 = vand.u32 2147483647, %v3040_v54 }
 0x170   :  { %v1011_v16 = vsel %vm928_vm15, %v1010_v26, %v1009_v17  ;;  %v713_v39 = vxor.u32 2147483648, %v3459_v28  ;;  %v717_v5 = vsel %vm715_vm9, %v716_v13, %v3459_v28  ;;  %v3479_v60 = vsel %vm3439_vm12, 0, %v910_v0 }
 0x171   :  { %vm3467_vm4 = vcmp.le.f32.partialorder %v3827_v3, 0.7853982  ;;  %vm712_vm8 = vcmp.eq.s32.totalorder %v710_v32, 0  ;;  %2491 = vsinq.f32 %v911_v33  ;;  %v1012_v49 = vsub.s32 4, %v3259_v7 }
 0x172   :  { %v1014_v10 = vsel %vm3467_vm4, %v3040_v54, %v1011_v16  ;;  %vm711_vm2 = vcmp.lt.s32.totalorder %v710_v32, 2  ;;  %v714_v11 = vsel %vm712_vm8, %v3443_v36, %v713_v39  ;;  %vm812_vm13 = vweird.f32 %v2899_v51 }
 0x173   :  { %v3490_v57 = vand.u32 3, %v3479_v60  ;;  %2493 = vcosq.f32 %v1014_v10  ;;  %v718_v17 = vsel %vm711_vm2, %v714_v11, %v717_v5  ;;  %vm814_vm3 = vcmp.lt.s32.totalorder %v813_v44, 2 }
 0x174   :  { %vm815_vm12 = vcmp.eq.s32.totalorder %v813_v44, 0  ;;  %v3830_v21 = vand.u32 2147483647, %v2922_v31  ;;  %v719_v32 = vsel %vm3800_vm11, nan, %v718_v17  ;;  %v1013_v59 = vsel %vm928_vm15, %v1012_v49, %v3259_v7 }
 0x175   :  { %2495 = vsinq.f32 %v1014_v10  ;;  %v1115_v14 = vsub.s32 4, %v3162_v27  ;;  %2178 = vst.msk [vmem:[#allocation2 + $0x28] sm:$0xff] %vm2172_vm7, %v719_v32  ;;  %2203 = vrot.lane.b32.xlu1 %v719_v32, %s2557_s1  ;;  %vm818_vm8 = vcmp.eq.s32.totalorder %v813_v44, 2  ;;  %v3510_v33 = vsel %vm3467_vm4, 0, %v1013_v59 }
 0x176   :  { %vm3494_vm9 = vcmp.le.f32.partialorder %v3830_v21, 0.7853982  ;;  %v1225_v7 = vadd.s32 3, %v3152_v58  ;;  %vm917_vm15 = vcmp.lt.s32.totalorder %v3490_v57, 2  ;;  %v3521_v16 = vand.u32 3, %v3510_v33 }
 0x177   :  { %v3504_v15 = vpop.eup %2485  ;;  %v1117_v26 = vsel %vm3494_vm9, %v2922_v31, %v1114_v55  ;;  %v1116_v62 = vsel %vm1031_vm5, %v1115_v14, %v3162_v27  ;;  %vm915_vm4 = vweird.f32 %v2854_v18  ;;  %vm918_vm2 = vcmp.eq.s32.totalorder %v3490_v57, 0 }
 0x178   :  { %v3516_v0 = vpop.eup %2487  ;;  %v819_v3 = vxor.u32 2147483648, %v3504_v15  ;;  %2497 = vcosq.f32 %v1117_v26  ;;  %v3530_v58 = vsel %vm3494_vm9, 0, %v1116_v62  ;;  %v1226_v55 = vand.u32 3, %v1225_v7 }
 0x179   :  { %v816_v5 = vxor.u32 2147483648, %v3516_v0  ;;  %2499 = vsinq.f32 %v1117_v26  ;;  %vm921_vm11 = vcmp.eq.s32.totalorder %v3490_v57, 2  ;;  %vm1021_vm5 = vcmp.eq.s32.totalorder %v3521_v16, 0  ;;  %v3538_v27 = vpop.eup %2489 }
 0x17a   :  { %v820_v49 = vsel %vm818_vm8, %v819_v3, %v3516_v0  ;;  %vm1024_vm10 = vcmp.eq.s32.totalorder %v3521_v16, 2  ;;  %v3547_v11 = vand.u32 3, %v3530_v58  ;;  %vm1228_vm8 = vcmp.eq.s32.totalorder %v1226_v55, 0 }
 0x17b   :  { %v817_v10 = vsel %vm815_vm12, %v3504_v15, %v816_v5  ;;  %v922_v21 = vxor.u32 2147483648, %v3538_v27  ;;  %vm1018_vm0 = vweird.f32 %v3040_v54  ;;  %vm1227_vm6 = vcmp.lt.s32.totalorder %v1226_v55, 2  ;;  %v3555_v32 = vpop.eup %2491 }
 0x17c   :  { %v821_v17 = vsel %vm814_vm3, %v817_v10, %v820_v49  ;;  %v1230_v52 = vsel %vm1228_vm8, %v3176_v20, %v198_v9  ;;  %vm1124_vm12 = vcmp.eq.s32.totalorder %v3547_v11, 0  ;;  %vm1127_vm1 = vcmp.eq.s32.totalorder %v3547_v11, 2 }
 0x17d   :  { %v822_v59 = vsel %vm812_vm13, nan, %v821_v17  ;;  %vm1231_vm9 = vcmp.eq.s32.totalorder %v1226_v55, 2  ;;  %v3561_v44 = vpop.eup %2493  ;;  %v919_v14 = vxor.u32 2147483648, %v3555_v32  ;;  %v923_v9 = vsel %vm921_vm11, %v922_v21, %v3555_v32 }
 0x17e   :  { %2205 = vrot.lane.b32.xlu0 %v822_v59, %s2557_s1  ;;  %2179 = vst.msk [vmem:[#allocation2 + $0x30] sm:$0xff] %vm2172_vm7, %v822_v59  ;;  %vm1123_vm3 = vcmp.lt.s32.totalorder %v3547_v11, 2  ;;  %v1233_v26 = vsel %vm1231_vm9, %v201_v1, %v3179_v42  ;;  %v1329_v7 = vadd.s32 3, %v3279_v37  ;;  %v1025_v62 = vxor.u32 2147483648, %v3561_v44 }
 0x17f   :  { %vm1121_vm8 = vweird.f32 %v2922_v31  ;;  %v1234_v49 = vsel %vm1227_vm6, %v1230_v52, %v1233_v26  ;;  %v1433_v10 = vadd.s32 3, %v3239_v6  ;;  %v1537_v17 = vadd.s32 3, %v3323_v46  ;;  %v3581_v59 = vpop.eup %2495 }
 0x180   :  { %v920_v20 = vsel %vm918_vm2, %v3538_v27, %v919_v14  ;;  %v1235_v42 = vsel %vm194_vm14, nan, %v1234_v49  ;;  %v1330_v1 = vand.u32 3, %v1329_v7  ;;  %v1641_v37 = vadd.s32 3, %v3349_v23 }
 0x181   :  { %v924_v55 = vsel %vm917_vm15, %v920_v20, %v923_v9  ;;  %v1022_v6 = vxor.u32 2147483648, %v3581_v59  ;;  %v1026_v46 = vsel %vm1024_vm10, %v1025_v62, %v3581_v59  ;;  %2234 = vst.msk [vmem:[#allocation4] sm:$0xff] %vm2172_vm7, %v1235_v42  ;;  %v1434_v52 = vand.u32 3, %v1433_v10 }
 0x182   :  { %v3600_v26 = vpop.eup %2497  ;;  %v925_v25 = vsel %vm915_vm4, nan, %v924_v55  ;;  %vm1331_vm14 = vcmp.lt.s32.totalorder %v1330_v1, 2  ;;  %vm1332_vm6 = vcmp.eq.s32.totalorder %v1330_v1, 0  ;;  %vm1335_vm11 = vcmp.eq.s32.totalorder %v1330_v1, 2 }
 0x183   :  { %v3604_v23 = vpop.eup %2499  ;;  %2180 = vst.msk [vmem:[#allocation2 + $0x38] sm:$0xff] %vm2172_vm7, %v925_v25  ;;  %2207 = vrot.lane.b32.xlu1 %v925_v25, %s2557_s1  ;;  %v1023_v57 = vsel %vm1021_vm5, %v3561_v44, %v1022_v6  ;;  %v1128_v9 = vxor.u32 2147483648, %v3600_v26  ;;  %v1334_v7 = vsel %vm1332_vm6, %v3330_v38, %v301_v30  ;;  %v1337_v49 = vsel %vm1335_vm11, %v304_v22, %v3351_v50 }
 0x184   :  { %vm3833_vm10 = vcmp.lt.s32.totalorder %v3521_v16, 2  ;;  %v1125_v20 = vxor.u32 2147483648, %v3604_v23  ;;  %v1338_v1 = vsel %vm1331_vm14, %v1334_v7, %v1337_v49  ;;  %vm1435_vm15 = vcmp.lt.s32.totalorder %v1434_v52, 2 }
 0x185   :  { %v1027_v10 = vsel %vm3833_vm10, %v1023_v57, %v1026_v46  ;;  %v1129_v30 = vsel %vm1127_vm1, %v1128_v9, %v3604_v23  ;;  %vm3834_vm2 = vweird.f32 %v2641_v47  ;;  %vm1436_vm5 = vcmp.eq.s32.totalorder %v1434_v52, 0 }
 0x186   :  { %v1028_v55 = vsel %vm1018_vm0, nan, %v1027_v10  ;;  %v1339_v38 = vsel %vm3834_vm2, nan, %v1338_v1  ;;  %v1126_v22 = vsel %vm1124_vm12, %v3600_v26, %v1125_v20  ;;  %v1438_v50 = vsel %vm1436_vm5, %v3308_v45, %v404_v8 }
 0x187   :  { %2209 = vrot.lane.b32.xlu0 %v1028_v55, %s2557_s1  ;;  %2181 = vst.msk [vmem:[#allocation2 + $0x40] sm:$0xff] %vm2172_vm7, %v1028_v55  ;;  %2235 = vst.msk [vmem:[#allocation4 + $0x8] sm:$0xff] %vm2172_vm7, %v1339_v38  ;;  %vm1439_vm1 = vcmp.eq.s32.totalorder %v1434_v52, 2  ;;  %v1538_v47 = vand.u32 3, %v1537_v17  ;;  %v1130_v16 = vsel %vm1123_vm3, %v1126_v22, %v1129_v30  ;;  %v1642_v25 = vand.u32 3, %v1641_v37 }
 0x188   :  { %v1441_v46 = vsel %vm1439_vm1, %v407_v29, %v3317_v48  ;;  %v1745_v57 = vadd.s32 3, %v3405_v63  ;;  %v1131_v7 = vsel %vm1121_vm8, nan, %v1130_v16  ;;  %vm3835_vm3 = vweird.f32 %v2618_v24 }
 0x189   :  { %v1442_v49 = vsel %vm1435_vm15, %v1438_v50, %v1441_v46  ;;  %vm1539_vm9 = vcmp.lt.s32.totalorder %v1538_v47, 2  ;;  %vm1540_vm12 = vcmp.eq.s32.totalorder %v1538_v47, 0  ;;  %2182 = vst.msk [vmem:[#allocation2 + $0x48] sm:$0xff] %vm2172_vm7, %v1131_v7  ;;  %2211 = vrot.lane.b32.xlu1 %v1131_v7, %s2557_s1  ;;  %vm1543_vm14 = vcmp.eq.s32.totalorder %v1538_v47, 2 }
 0x18a   :  { %v1443_v8 = vsel %vm3835_vm3, nan, %v1442_v49  ;;  %v1542_v45 = vsel %vm1540_vm12, %v3375_v35, %v507_v19  ;;  %vm1643_vm6 = vcmp.lt.s32.totalorder %v1642_v25, 2  ;;  %v1545_v48 = vsel %vm1543_vm14, %v510_v12, %v3382_v4 }
 0x18b   :  { %2254 = vrot.lane.b32.xlu0 %v1235_v42, %s2557_s1  ;;  %2236 = vst.msk [vmem:[#allocation4 + $0x10] sm:$0xff] %vm2172_vm7, %v1443_v8  ;;  %vm1644_vm11 = vcmp.eq.s32.totalorder %v1642_v25, 0  ;;  %vm1647_vm10 = vcmp.eq.s32.totalorder %v1642_v25, 2  ;;  %v1746_v29 = vand.u32 3, %v1745_v57  ;;  %v1546_v63 = vsel %vm1539_vm9, %v1542_v45, %v1545_v48 }
 0x18c   :  { %v1646_v24 = vsel %vm1644_vm11, %v3407_v2, %v610_v41  ;;  %v1649_v19 = vsel %vm1647_vm10, %v613_v40, %v3412_v53  ;;  %v1849_v11 = vadd.s32 3, %v3435_v56  ;;  %vm3836_vm15 = vweird.f32 %v2632_v34 }
 0x18d   :  { %v1547_v17 = vsel %vm3836_vm15, nan, %v1546_v63  ;;  %v1650_v42 = vsel %vm1643_vm6, %v1646_v24, %v1649_v19  ;;  %vm1747_vm2 = vcmp.lt.s32.totalorder %v1746_v29, 2  ;;  %vm1748_vm5 = vcmp.eq.s32.totalorder %v1746_v29, 0  ;;  %2256 = vrot.lane.b32.xlu1 %v1339_v38, %s2557_s1 }
 0x18e   :  { %2237 = vst.msk [vmem:[#allocation4 + $0x18] sm:$0xff] %vm2172_vm7, %v1547_v17  ;;  %vm3837_vm1 = vweird.f32 %v2839_v43  ;;  %v1750_v4 = vsel %vm1748_vm5, %v3443_v36, %v713_v39  ;;  %vm1751_vm9 = vcmp.eq.s32.totalorder %v1746_v29, 2  ;;  %v1850_v12 = vand.u32 3, %v1849_v11 }
 0x18f   :  { %v1651_v35 = vsel %vm3837_vm1, nan, %v1650_v42  ;;  %2258 = vrot.lane.b32.xlu0 %v1443_v8, %s2557_s1  ;;  %v1753_v34 = vsel %vm1751_vm9, %v716_v13, %v3459_v28  ;;  %v1953_v2 = vadd.s32 3, %v3479_v60  ;;  %v2057_v53 = vadd.s32 3, %v3510_v33 }
 0x190   :  { %2238 = vst.msk [vmem:[#allocation4 + $0x20] sm:$0xff] %vm2172_vm7, %v1651_v35  ;;  %v2161_v43 = vadd.s32 3, %v3530_v58  ;;  %v1754_v40 = vsel %vm1747_vm2, %v1750_v4, %v1753_v34  ;;  %vm1851_vm12 = vcmp.lt.s32.totalorder %v1850_v12, 2  ;;  %vm1852_vm3 = vcmp.eq.s32.totalorder %v1850_v12, 0 }
 0x191   :  { %vm1855_vm14 = vcmp.eq.s32.totalorder %v1850_v12, 2  ;;  %vm3838_vm6 = vweird.f32 %v2770_v61  ;;  %v1854_v56 = vsel %vm1852_vm3, %v3504_v15, %v816_v5  ;;  %v1954_v13 = vand.u32 3, %v1953_v2  ;;  %2260 = vrot.lane.b32.xlu1 %v1547_v17, %s2557_s1 }
 0x192   :  { %v1755_v41 = vsel %vm3838_vm6, nan, %v1754_v40  ;;  %v1857_v36 = vsel %vm1855_vm14, %v819_v3, %v3516_v0  ;;  %v2058_v39 = vand.u32 3, %v2057_v53  ;;  %v2162_v60 = vand.u32 3, %v2161_v43 }
 0x193   :  { %2239 = vst.msk [vmem:[#allocation4 + $0x28] sm:$0xff] %vm2172_vm7, %v1755_v41  ;;  %v1858_v28 = vsel %vm1851_vm12, %v1854_v56, %v1857_v36  ;;  %2262 = vrot.lane.b32.xlu0 %v1651_v35, %s2557_s1  ;;  %vm1956_vm11 = vcmp.eq.s32.totalorder %v1954_v13, 0  ;;  %vm1959_vm10 = vcmp.eq.s32.totalorder %v1954_v13, 2  ;;  %vm1955_vm15 = vcmp.lt.s32.totalorder %v1954_v13, 2 }
 0x194   :  { %v1859_v61 = vsel %vm812_vm13, nan, %v1858_v28  ;;  %v1958_v15 = vsel %vm1956_vm11, %v3538_v27, %v919_v14  ;;  %v1961_v33 = vsel %vm1959_vm10, %v922_v21, %v3555_v32  ;;  %vm2060_vm2 = vcmp.eq.s32.totalorder %v2058_v39, 0 }
 0x195   :  { %2240 = vst.msk [vmem:[#allocation4 + $0x30] sm:$0xff] %vm2172_vm7, %v1859_v61  ;;  %v1962_v0 = vsel %vm1955_vm15, %v1958_v15, %v1961_v33  ;;  %vm2059_vm5 = vcmp.lt.s32.totalorder %v2058_v39, 2  ;;  %v2062_v51 = vsel %vm2060_vm2, %v3561_v44, %v1022_v6  ;;  %vm2063_vm13 = vcmp.eq.s32.totalorder %v2058_v39, 2  ;;  %2264 = vrot.lane.b32.xlu1 %v1755_v41, %s2557_s1 }
 0x196   :  { %v1963_v3 = vsel %vm915_vm4, nan, %v1962_v0  ;;  %v2065_v5 = vsel %vm2063_vm13, %v1025_v62, %v3581_v59  ;;  %vm2164_vm1 = vcmp.eq.s32.totalorder %v2162_v60, 0  ;;  %vm2167_vm9 = vcmp.eq.s32.totalorder %v2162_v60, 2 }
 0x197   :  { %2266 = vrot.lane.b32.xlu0 %v1859_v61, %s2557_s1  ;;  %2241 = vst.msk [vmem:[#allocation4 + $0x38] sm:$0xff] %vm2172_vm7, %v1963_v3  ;;  %v2066_v58 = vsel %vm2059_vm5, %v2062_v51, %v2065_v5  ;;  %vm2163_vm12 = vcmp.lt.s32.totalorder %v2162_v60, 2  ;;  %v2166_v27 = vsel %vm2164_vm1, %v3600_v26, %v1125_v20  ;;  %v2169_v18 = vsel %vm2167_vm9, %v1128_v9, %v3604_v23 }
 0x198   :  { %v2067_v21 = vsel %vm1018_vm0, nan, %v2066_v58  ;;  %v2170_v32 = vsel %vm2163_vm12, %v2166_v27, %v2169_v18  ;;  %vm2223_vm4 = vcmask 1048064  }
 0x199   :  { %2242 = vst.msk [vmem:[#allocation4 + $0x40] sm:$0xff] %vm2172_vm7, %v2067_v21  ;;  %v2171_v44 = vsel %vm1121_vm8, nan, %v2170_v32  ;;  %2268 = vrot.lane.b32.xlu1 %v1963_v3, %s2557_s1 }
 0x19a   :  { %2243 = vst.msk [vmem:[#allocation4 + $0x48] sm:$0xff] %vm2172_vm7, %v2171_v44 }
 0x19b   :  { %2270 = vrot.lane.b32.xlu0 %v2067_v21, %s2557_s1 }
 0x19d   :  { %2272 = vrot.lane.b32.xlu1 %v2171_v44, %s2557_s1 }
 0x1bd   :  { %v2194_v14 = vpop.permute.xlu0 %2193 }
 0x1be   :  { %2224 = vst.msk [vmem:[#allocation2] sm:$0xff] %vm2223_vm4, %v2194_v14 }
 0x1d0   :  { %v2198_v54 = vpop.permute.xlu0 %2197 }
 0x1d1   :  { %2226 = vst.msk [vmem:[#allocation2 + $0x10] sm:$0xff] %vm2223_vm4, %v2198_v54 }
 0x1d6   :  { %v2196_v62 = vpop.permute.xlu1 %2195 }
 0x1d7   :  { %2225 = vst.msk [vmem:[#allocation2 + $0x8] sm:$0xff] %vm2223_vm4, %v2196_v62 }
 0x1db   :  { %v2200_v31 = vpop.permute.xlu1 %2199 }
 0x1dc   :  { %2227 = vst.msk [vmem:[#allocation2 + $0x18] sm:$0xff] %vm2223_vm4, %v2200_v31 }
 0x1e0   :  { %v2202_v59 = vpop.permute.xlu0 %2201 }
 0x1e1   :  { %2228 = vst.msk [vmem:[#allocation2 + $0x20] sm:$0xff] %vm2223_vm4, %v2202_v59 }
 0x1e7   :  { %v2204_v37 = vpop.permute.xlu1 %2203 }
 0x1e8   :  { %2229 = vst.msk [vmem:[#allocation2 + $0x28] sm:$0xff] %vm2223_vm4, %v2204_v37 }
 0x1f0   :  { %v2206_v6 = vpop.permute.xlu0 %2205 }
 0x1f1   :  { %2230 = vst.msk [vmem:[#allocation2 + $0x30] sm:$0xff] %vm2223_vm4, %v2206_v6 }
 0x1f5   :  { %v2208_v52 = vpop.permute.xlu1 %2207 }
 0x1f6   :  { %2231 = vst.msk [vmem:[#allocation2 + $0x38] sm:$0xff] %vm2223_vm4, %v2208_v52 }
 0x1f9   :  { %v2210_v26 = vpop.permute.xlu0 %2209 }
 0x1fa   :  { %2232 = vst.msk [vmem:[#allocation2 + $0x40] sm:$0xff] %vm2223_vm4, %v2210_v26 }
 0x1fb   :  { %v2212_v23 = vpop.permute.xlu1 %2211 }
 0x1fc   :  { %2233 = vst.msk [vmem:[#allocation2 + $0x48] sm:$0xff] %vm2223_vm4, %v2212_v23 }
 0x1fd   :  { %v2255_v9 = vpop.permute.xlu0 %2254 }
 0x1fe   :  { %2284 = vst.msk [vmem:[#allocation4] sm:$0xff] %vm2223_vm4, %v2255_v9 }
 0x1ff   :  { %2513 = shalt.err (!%p2510_p4)
}
 0x200   :  { %s2514_s13 = scalar_lea.hbm %s3786_s2, 1280 }
 0x201   :  { %p2515_p5 = scmp.ne.s32.totalorder %s3786_s2, %s2514_s13  ;;  %p2518_p6 = scmp.lt.u32.totalorder %s2514_s13, %s3786_s2 }
 0x203   :  { %p2520_p7 = pnand %p2518_p6, %p2515_p5 }
 0x205   :  { %2523 = shalt.err (!%p2520_p7)
}
 0x206   :  { %s2559_s18 = smov 128   ;;  %s2560_s19 = smov 8   ;;  %v2257_v10 = vpop.permute.xlu1 %2256  ;;  %v2259_v20 = vpop.permute.xlu0 %2258 }
 0x207   :  { %2305 = dma.vmem_to_hbm [thread:$0]  %s2300_s9, 1280, %s3786_s2, [#allocation3], %s2559_s18, %s2559_s18, %s2560_s19   ;;  %2285 = vst.msk [vmem:[#allocation4 + $0x8] sm:$0xff] %vm2223_vm4, %v2257_v10  ;;  %2286 = vst.msk [vmem:[#allocation4 + $0x10] sm:$0xff] %vm2223_vm4, %v2259_v20 }
 0x208   :  { %s2561_s2 = smov [#allocation4]  }
 0x209   :  { %s2311_s22 = sshll.u32 %s2561_s2, 4  ;;  %s2312_s22 = int_to_ptr.vmem [resolvable:$true] %s2311_s22 }
 0x20a   :  { %v2261_v1 = vpop.permute.xlu1 %2260  ;;  %v2263_v55 = vpop.permute.xlu0 %2262  ;;  %s2524_s23 = scalar_lea.vmem %s2312_s22, 1280  ;;  %p2529_p9 = scmp.lt.s32.totalorder %s2312_s22, %s2312_s22 }
 0x20b   :  { %2287 = vst.msk [vmem:[#allocation4 + $0x18] sm:$0xff] %vm2223_vm4, %v2261_v1  ;;  %2288 = vst.msk [vmem:[#allocation4 + $0x20] sm:$0xff] %vm2223_vm4, %v2263_v55  ;;  %p2525_p8 = scmp.ne.s32.totalorder %s2312_s22, %s2524_s23  ;;  %p2530_p10 = scmp.lt.s32.totalorder %s2524_s23, %s2524_s23 }
 0x20d   :  { %p2531_p11 = por %p2530_p10, %p2529_p9 }
 0x20e   :  { %v2265_v30 = vpop.permute.xlu1 %2264  ;;  %v2267_v38 = vpop.permute.xlu0 %2266 }
 0x20f   :  { %2289 = vst.msk [vmem:[#allocation4 + $0x28] sm:$0xff] %vm2223_vm4, %v2265_v30  ;;  %2290 = vst.msk [vmem:[#allocation4 + $0x30] sm:$0xff] %vm2223_vm4, %v2267_v38  ;;  %p2532_p12 = pnand %p2531_p11, %p2525_p8 }
 0x212   :  { %v2269_v22 = vpop.permute.xlu1 %2268  ;;  %v2271_v50 = vpop.permute.xlu0 %2270 }
 0x213   :  { %2291 = vst.msk [vmem:[#allocation4 + $0x38] sm:$0xff] %vm2223_vm4, %v2269_v22  ;;  %2292 = vst.msk [vmem:[#allocation4 + $0x40] sm:$0xff] %vm2223_vm4, %v2271_v50 }
 0x216   :  { %v2273_v47 = vpop.permute.xlu1 %2272 }
 0x217   :  { %2293 = vst.msk [vmem:[#allocation4 + $0x48] sm:$0xff] %vm2223_vm4, %v2273_v47 }
 0x218   :  { %2535 = shalt.err (!%p2532_p12)
}
 0x219   :  { %s2536_s26 = scalar_lea.hbm %s3787_s3, 1280 }
 0x21a   :  { %p2537_p13 = scmp.ne.s32.totalorder %s3787_s3, %s2536_s26  ;;  %p2540_p0 = scmp.lt.u32.totalorder %s2536_s26, %s3787_s3 }
 0x21c   :  { %p2542_p1 = pnand %p2540_p0, %p2537_p13 }
 0x21e   :  { %2545 = shalt.err (!%p2542_p1)
}
 0x21f   :  { %2317 = dma.vmem_to_hbm [thread:$0]  %s2312_s22, 1280, %s3787_s3, [#allocation5], %s2559_s18, %s2559_s18, %s2560_s19  }
 0x220   :  { %2546 = dma.done.wait [#allocation3], 1280  }
 0x221   :  { %2547 = vsyncadd [#allocation3], 4294966016 }
 0x222   :  { %2548 = dma.done.wait [#allocation5], 1280  }
 0x223   :  { %2549 = vsyncadd [#allocation5], 4294966016 }
 0x224   :  { %2324 = vsyncpa [#allocation3], 1 }
 0x225   :  { %2325 = vsyncpa [#allocation5], 1 }

</bundles_post_ra>
